<compile_context>
chip_gen: v7x
topology: tpu7x:2x2x1
jax: 0.10.0
libtpu: 0.0.40
codegen_flags: <defaults>
</compile_context>

<pallas_src>
import jax
import jax.numpy as jnp
from jax.experimental import pallas as pl
from jax.experimental.pallas import tpu as pltpu


def gru_recurrence_kernel(gi_r_ref, gi_z_ref, gi_n_ref, whh_ref, bhh_ref,
                          out_ref, hn_ref):
    """Sequential GRU recurrence (PyTorch gate order [r, z, n]).

    gi_*_ref : (T, Bb, H) f32   precomputed x @ W_i*^T + b_i* (one slab per gate)
    whh_ref  : (3, H, H)  bf16  W_h*^T stacked per gate (ready for h @ W)
    bhh_ref  : (3, 1, H)  f32
    out_ref  : (T, Bb, H) f32   per-step hidden states (resident, one writeback)
    hn_ref   : (1, Bb, H) f32   final hidden state
    """
    T, Bb, H = out_ref.shape

    # Load recurrent weights/biases once (gates live on a non-lane leading axis).
    w_hr = whh_ref[0]          # (H, H) bf16
    w_hz = whh_ref[1]
    w_hn = whh_ref[2]
    b_hr = bhh_ref[0]          # (1, H) f32
    b_hz = bhh_ref[1]
    b_hn = bhh_ref[2]

    def step(t, h_prev):
        hb = h_prev.astype(jnp.bfloat16)
        # Only the hidden projection remains on the serial path (per-gate dots,
        # f32 accumulation on the MXU).
        gh_r = jnp.dot(hb, w_hr, preferred_element_type=jnp.float32) + b_hr
        gh_z = jnp.dot(hb, w_hz, preferred_element_type=jnp.float32) + b_hz
        gh_n = jnp.dot(hb, w_hn, preferred_element_type=jnp.float32) + b_hn

        r = jax.nn.sigmoid(gi_r_ref[t] + gh_r)
        z = jax.nn.sigmoid(gi_z_ref[t] + gh_z)
        n = jnp.tanh(gi_n_ref[t] + r * gh_n)
        h_new = (1.0 - z) * n + z * h_prev

        out_ref[t] = h_new.astype(out_ref.dtype)
        return h_new

    h0 = jnp.zeros((Bb, H), jnp.float32)
    # Small fixed T -> full unroll gives the LLO scheduler visibility to overlap
    # the matmuls with the VPU/EUP gate math.  (Cap the unroll factor for large T.)
    h_final = jax.lax.fori_loop(0, T, step, h0, unroll=True)
    hn_ref[0] = h_final.astype(hn_ref.dtype)


def prepare_encoder_params(emb_table, w_ih, w_hh, b_ih, b_hh):
    """One-time weight re-layout (do NOT redo per forward call)."""
    H = emb_table.shape[1]
    # PyTorch stacks gates [r, z, n] along dim 0 of (3H, H) weights.
    wih_g = w_ih.reshape(3, H, H)                                        # (gate, out, in)
    whh_g = jnp.transpose(w_hh.reshape(3, H, H), (0, 2, 1))              # (gate, in, out)
    return {
        "emb": emb_table,                                                # (V, H) f32
        "wih": wih_g,                                                    # (3, H, H) f32
        "bih": b_ih.reshape(3, 1, H),                                    # (3, 1, H) f32
        "whh": whh_g.astype(jnp.bfloat16),                               # (3, H, H) bf16
        "bhh": b_hh.reshape(3, 1, H),                                    # (3, 1, H) f32
    }


def encoder_rnn_forward(tokens, params):
    """
    tokens: (B, T) int32
    returns (output (B, T, H), hidden (1, B, H)) — same semantics as
    nn.GRU(batch_first=True) applied to nn.Dropout(nn.Embedding(tokens)) in eval mode.
    """
    emb = params["emb"]
    B, T = tokens.shape
    H = emb.shape[1]

    # Embedding lookup (data-dependent gather -> JAX glue).
    embedded = emb[tokens]                                               # (B, T, H) f32
    # TODO(synk): training-mode dropout mask (p=0.1) omitted; matches nn.Dropout in eval().

    # Hoisted input projection: one large GEMM instead of T tiny matmuls inside
    # the recurrence.  Output is gate-major / time-major so the kernel's per-step
    # reads are whole (B, H) tiles (no lane-crossing gate slices).
    gi = jnp.einsum("bti,goi->gtbo", embedded, params["wih"]) + params["bih"][:, None]
    gi_r, gi_z, gi_n = gi[0], gi[1], gi[2]                               # each (T, B, H) f32

    # Batch grid axis marked "parallel": with B=2 this is a single grid point;
    # on v7x pick b_block = B // 2 for batches large enough to split across TCs.
    b_block = B
    grid = (B // b_block,)

    out_tbh, hn = pl.pallas_call(
        gru_recurrence_kernel,
        grid=grid,
        in_specs=[
            pl.BlockSpec((T, b_block, H), lambda b: (0, b, 0)),          # gi_r (VMEM-resident)
            pl.BlockSpec((T, b_block, H), lambda b: (0, b, 0)),          # gi_z
            pl.BlockSpec((T, b_block, H), lambda b: (0, b, 0)),          # gi_n
            pl.BlockSpec((3, H, H), lambda b: (0, 0, 0)),                # W_hh^T per gate (bf16)
            pl.BlockSpec((3, 1, H), lambda b: (0, 0, 0)),                # b_hh per gate
        ],
        out_specs=[
            pl.BlockSpec((T, b_block, H), lambda b: (0, b, 0)),          # all steps, one writeback
            pl.BlockSpec((1, b_block, H), lambda b: (0, b, 0)),          # final hidden
        ],
        out_shape=[
            jax.ShapeDtypeStruct((T, B, H), jnp.float32),
            jax.ShapeDtypeStruct((1, B, H), jnp.float32),
        ],
        compiler_params=pltpu.CompilerParams(
            dimension_semantics=("parallel",),
        ),
    )(gi_r, gi_z, gi_n, params["whh"], params["bhh"])

    output = jnp.transpose(out_tbh, (1, 0, 2))                           # back to batch_first
    return output, hn


def encoder_rnn_reference(tokens, emb_table, w_ih, w_hh, b_ih, b_hh):
    """Pure-JAX f32 reference matching torch.nn.GRU(batch_first=True)."""
    B, T = tokens.shape
    H = emb_table.shape[1]
    x = emb_table[tokens]
    h = jnp.zeros((B, H), jnp.float32)
    outs = []
    for t in range(T):
        gi = x[:, t, :] @ w_ih.T + b_ih
        gh = h @ w_hh.T + b_hh
        i_r, i_z, i_n = gi[:, :H], gi[:, H:2 * H], gi[:, 2 * H:]
        h_r, h_z, h_n = gh[:, :H], gh[:, H:2 * H], gh[:, 2 * H:]
        r = jax.nn.sigmoid(i_r + h_r)
        z = jax.nn.sigmoid(i_z + h_z)
        n = jnp.tanh(i_n + r * h_n)
        h = (1.0 - z) * n + z * h
        outs.append(h)
    return jnp.stack(outs, axis=1), h[None]


if __name__ == "__main__":
    # Small shapes consistent with the module.
    V, H = 20, 32          # input_size (vocab), hidden_size
    B, T = 2, 8            # batch, seq length

    key = jax.random.PRNGKey(0)
    k_emb, k_wih, k_whh, k_bih, k_bhh, k_tok = jax.random.split(key, 6)

    # nn.Embedding default init: N(0, 1)
    emb_table = jax.random.normal(k_emb, (V, H), dtype=jnp.float32)

    # nn.GRU default init: U(-1/sqrt(H), 1/sqrt(H))
    bound = 1.0 / (H ** 0.5)
    w_ih = jax.random.uniform(k_wih, (3 * H, H), jnp.float32, -bound, bound)
    w_hh = jax.random.uniform(k_whh, (3 * H, H), jnp.float32, -bound, bound)
    b_ih = jax.random.uniform(k_bih, (3 * H,), jnp.float32, -bound, bound)
    b_hh = jax.random.uniform(k_bhh, (3 * H,), jnp.float32, -bound, bound)

    tokens = jax.random.randint(k_tok, (B, T), 0, V, dtype=jnp.int32)

    params = prepare_encoder_params(emb_table, w_ih, w_hh, b_ih, b_hh)
    fwd = jax.jit(encoder_rnn_forward)

    output, hidden = fwd(tokens, params)
    jax.block_until_ready((output, hidden))

    assert output.shape == (B, T, H), output.shape
    assert hidden.shape == (1, B, H), hidden.shape

    # Numerical check against a pure-JAX f32 reference (bf16 recurrent weights
    # introduce only tiny drift at these shapes).
    ref_out, ref_hn = encoder_rnn_reference(tokens, emb_table, w_ih, w_hh, b_ih, b_hh)
    err_o = float(jnp.max(jnp.abs(output - ref_out)))
    err_h = float(jnp.max(jnp.abs(hidden - ref_hn)))
    assert err_o < 5e-2, f"output mismatch: {err_o}"
    assert err_h < 5e-2, f"hidden mismatch: {err_h}"

    print("KERNEL_OK")
</pallas_src>

<mosaic_0001>
module attributes {stable_mosaic.version = 11 : i64} {
  func.func @gru_recurrence_kernel(%arg0: i32, %arg1: memref<8x2x32xf32, #tpu.memory_space<vmem>>, %arg2: memref<8x2x32xf32, #tpu.memory_space<vmem>>, %arg3: memref<8x2x32xf32, #tpu.memory_space<vmem>>, %arg4: memref<3x32x32xbf16, #tpu.memory_space<vmem>>, %arg5: memref<3x1x32xf32, #tpu.memory_space<vmem>>, %arg6: memref<8x2x32xf32, #tpu.memory_space<vmem>>, %arg7: memref<1x2x32xf32, #tpu.memory_space<vmem>>) attributes {dimension_semantics = [#tpu.dimension_semantics<parallel>], iteration_bounds = array<i64: 1>, scalar_prefetch = 0 : i64, scratch_operands = 0 : i64, tpu.core_type = #tpu.core_type<tc>, window_params = [{transform_indices = @transform_0, window_bounds = array<i64: 8, 2, 32>}, {transform_indices = @transform_1, window_bounds = array<i64: 8, 2, 32>}, {transform_indices = @transform_2, window_bounds = array<i64: 8, 2, 32>}, {pipeline_mode = #tpu.pipeline_mode<synchronous>, transform_indices = @transform_3, window_bounds = array<i64: 3, 32, 32>}, {pipeline_mode = #tpu.pipeline_mode<synchronous>, transform_indices = @transform_4, window_bounds = array<i64: 3, 1, 32>}, {transform_indices = @transform_5, window_bounds = array<i64: 8, 2, 32>}, {transform_indices = @transform_6, window_bounds = array<i64: 1, 2, 32>}]} {
    %c0 = arith.constant 0 : index
    %c0_0 = arith.constant 0 : index
    %c0_1 = arith.constant 0 : index
    %0 = vector.load %arg4[%c0, %c0_0, %c0_1] : memref<3x32x32xbf16, #tpu.memory_space<vmem>>, vector<1x32x32xbf16>
    %1 = vector.shape_cast %0 : vector<1x32x32xbf16> to vector<32x32xbf16>
    %c1 = arith.constant 1 : index
    %c0_2 = arith.constant 0 : index
    %c0_3 = arith.constant 0 : index
    %2 = vector.load %arg4[%c1, %c0_2, %c0_3] : memref<3x32x32xbf16, #tpu.memory_space<vmem>>, vector<1x32x32xbf16>
    %3 = vector.shape_cast %2 : vector<1x32x32xbf16> to vector<32x32xbf16>
    %c2 = arith.constant 2 : index
    %c0_4 = arith.constant 0 : index
    %c0_5 = arith.constant 0 : index
    %4 = vector.load %arg4[%c2, %c0_4, %c0_5] : memref<3x32x32xbf16, #tpu.memory_space<vmem>>, vector<1x32x32xbf16>
    %5 = vector.shape_cast %4 : vector<1x32x32xbf16> to vector<32x32xbf16>
    %c0_6 = arith.constant 0 : index
    %c0_7 = arith.constant 0 : index
    %c0_8 = arith.constant 0 : index
    %6 = vector.load %arg5[%c0_6, %c0_7, %c0_8] : memref<3x1x32xf32, #tpu.memory_space<vmem>>, vector<1x1x32xf32>
    %7 = vector.shape_cast %6 : vector<1x1x32xf32> to vector<1x32xf32>
    %c1_9 = arith.constant 1 : index
    %c0_10 = arith.constant 0 : index
    %c0_11 = arith.constant 0 : index
    %8 = vector.load %arg5[%c1_9, %c0_10, %c0_11] : memref<3x1x32xf32, #tpu.memory_space<vmem>>, vector<1x1x32xf32>
    %9 = vector.shape_cast %8 : vector<1x1x32xf32> to vector<1x32xf32>
    %c2_12 = arith.constant 2 : index
    %c0_13 = arith.constant 0 : index
    %c0_14 = arith.constant 0 : index
    %10 = vector.load %arg5[%c2_12, %c0_13, %c0_14] : memref<3x1x32xf32, #tpu.memory_space<vmem>>, vector<1x1x32xf32>
    %11 = vector.shape_cast %10 : vector<1x1x32xf32> to vector<1x32xf32>
    %cst = arith.constant 0.000000e+00 : f32
    %12 = vector.broadcast %cst : f32 to vector<2x32xf32>
    %c0_i32 = arith.constant 0 : i32
    %13 = arith.truncf %12 : vector<2x32xf32> to vector<2x32xbf16>
    %cst_15 = arith.constant dense<0.000000e+00> : vector<2x32xf32>
    %14 = tpu.matmul %13, %1, %cst_15 {dimension_numbers = #tpu.dot_dimension_numbers<[1], [0], [0], [1], [0, 0, 1, 1], [], []>} : vector<2x32xbf16>, vector<32x32xbf16>, vector<2x32xf32> -> vector<2x32xf32>
    %15 = vector.broadcast %7 : vector<1x32xf32> to vector<2x32xf32>
    %16 = arith.addf %14, %15 : vector<2x32xf32>
    %cst_16 = arith.constant dense<0.000000e+00> : vector<2x32xf32>
    %17 = tpu.matmul %13, %3, %cst_16 {dimension_numbers = #tpu.dot_dimension_numbers<[1], [0], [0], [1], [0, 0, 1, 1], [], []>} : vector<2x32xbf16>, vector<32x32xbf16>, vector<2x32xf32> -> vector<2x32xf32>
    %18 = vector.broadcast %9 : vector<1x32xf32> to vector<2x32xf32>
    %19 = arith.addf %17, %18 : vector<2x32xf32>
    %cst_17 = arith.constant dense<0.000000e+00> : vector<2x32xf32>
    %20 = tpu.matmul %13, %5, %cst_17 {dimension_numbers = #tpu.dot_dimension_numbers<[1], [0], [0], [1], [0, 0, 1, 1], [], []>} : vector<2x32xbf16>, vector<32x32xbf16>, vector<2x32xf32> -> vector<2x32xf32>
    %21 = vector.broadcast %11 : vector<1x32xf32> to vector<2x32xf32>
    %22 = arith.addf %20, %21 : vector<2x32xf32>
    %23 = arith.index_cast %c0_i32 : i32 to index
    %c0_18 = arith.constant 0 : index
    %c0_19 = arith.constant 0 : index
    %24 = vector.load %arg1[%23, %c0_18, %c0_19] : memref<8x2x32xf32, #tpu.memory_space<vmem>>, vector<1x2x32xf32>
    %25 = vector.shape_cast %24 : vector<1x2x32xf32> to vector<2x32xf32>
    %26 = arith.addf %25, %16 : vector<2x32xf32>
    %27 = arith.negf %26 : vector<2x32xf32>
    %28 = math.exp %27 : vector<2x32xf32>
    %cst_20 = arith.constant 1.000000e+00 : f32
    %29 = vector.broadcast %cst_20 : f32 to vector<2x32xf32>
    %30 = arith.addf %29, %28 : vector<2x32xf32>
    %31 = arith.divf %29, %30 : vector<2x32xf32>
    %32 = arith.index_cast %c0_i32 : i32 to index
    %c0_21 = arith.constant 0 : index
    %c0_22 = arith.constant 0 : index
    %33 = vector.load %arg2[%32, %c0_21, %c0_22] : memref<8x2x32xf32, #tpu.memory_space<vmem>>, vector<1x2x32xf32>
    %34 = vector.shape_cast %33 : vector<1x2x32xf32> to vector<2x32xf32>
    %35 = arith.addf %34, %19 : vector<2x32xf32>
    %36 = arith.negf %35 : vector<2x32xf32>
    %37 = math.exp %36 : vector<2x32xf32>
    %cst_23 = arith.constant 1.000000e+00 : f32
    %38 = vector.broadcast %cst_23 : f32 to vector<2x32xf32>
    %39 = arith.addf %38, %37 : vector<2x32xf32>
    %40 = arith.divf %38, %39 : vector<2x32xf32>
    %41 = arith.index_cast %c0_i32 : i32 to index
    %c0_24 = arith.constant 0 : index
    %c0_25 = arith.constant 0 : index
    %42 = vector.load %arg3[%41, %c0_24, %c0_25] : memref<8x2x32xf32, #tpu.memory_space<vmem>>, vector<1x2x32xf32>
    %43 = vector.shape_cast %42 : vector<1x2x32xf32> to vector<2x32xf32>
    %44 = arith.mulf %31, %22 : vector<2x32xf32>
    %45 = arith.addf %43, %44 : vector<2x32xf32>
    %46 = math.tanh %45 : vector<2x32xf32>
    %cst_26 = arith.constant 1.000000e+00 : f32
    %47 = vector.broadcast %cst_26 : f32 to vector<2x32xf32>
    %48 = arith.subf %47, %40 : vector<2x32xf32>
    %49 = arith.mulf %48, %46 : vector<2x32xf32>
    %50 = arith.mulf %40, %12 : vector<2x32xf32>
    %51 = arith.addf %49, %50 : vector<2x32xf32>
    %52 = arith.index_cast %c0_i32 : i32 to index
    %c0_27 = arith.constant 0 : index
    %c0_28 = arith.constant 0 : index
    %53 = vector.load %arg6[%52, %c0_27, %c0_28] : memref<8x2x32xf32, #tpu.memory_space<vmem>>, vector<1x2x32xf32>
    %54 = vector.shape_cast %53 : vector<1x2x32xf32> to vector<2x32xf32>
    %55 = vector.shape_cast %51 : vector<2x32xf32> to vector<1x2x32xf32>
    tpu.vector_store %arg6[%52, %c0_27, %c0_28], %55 {strides = array<i32>} : memref<8x2x32xf32, #tpu.memory_space<vmem>>, vector<1x2x32xf32>,
    %c1_i32 = arith.constant 1 : i32
    %56 = arith.truncf %51 : vector<2x32xf32> to vector<2x32xbf16>
    %cst_29 = arith.constant dense<0.000000e+00> : vector<2x32xf32>
    %57 = tpu.matmul %56, %1, %cst_29 {dimension_numbers = #tpu.dot_dimension_numbers<[1], [0], [0], [1], [0, 0, 1, 1], [], []>} : vector<2x32xbf16>, vector<32x32xbf16>, vector<2x32xf32> -> vector<2x32xf32>
    %58 = vector.broadcast %7 : vector<1x32xf32> to vector<2x32xf32>
    %59 = arith.addf %57, %58 : vector<2x32xf32>
    %cst_30 = arith.constant dense<0.000000e+00> : vector<2x32xf32>
    %60 = tpu.matmul %56, %3, %cst_30 {dimension_numbers = #tpu.dot_dimension_numbers<[1], [0], [0], [1], [0, 0, 1, 1], [], []>} : vector<2x32xbf16>, vector<32x32xbf16>, vector<2x32xf32> -> vector<2x32xf32>
    %61 = vector.broadcast %9 : vector<1x32xf32> to vector<2x32xf32>
    %62 = arith.addf %60, %61 : vector<2x32xf32>
    %cst_31 = arith.constant dense<0.000000e+00> : vector<2x32xf32>
    %63 = tpu.matmul %56, %5, %cst_31 {dimension_numbers = #tpu.dot_dimension_numbers<[1], [0], [0], [1], [0, 0, 1, 1], [], []>} : vector<2x32xbf16>, vector<32x32xbf16>, vector<2x32xf32> -> vector<2x32xf32>
    %64 = vector.broadcast %11 : vector<1x32xf32> to vector<2x32xf32>
    %65 = arith.addf %63, %64 : vector<2x32xf32>
    %66 = arith.index_cast %c1_i32 : i32 to index
    %c0_32 = arith.constant 0 : index
    %c0_33 = arith.constant 0 : index
    %67 = vector.load %arg1[%66, %c0_32, %c0_33] : memref<8x2x32xf32, #tpu.memory_space<vmem>>, vector<1x2x32xf32>
    %68 = vector.shape_cast %67 : vector<1x2x32xf32> to vector<2x32xf32>
    %69 = arith.addf %68, %59 : vector<2x32xf32>
    %70 = arith.negf %69 : vector<2x32xf32>
    %71 = math.exp %70 : vector<2x32xf32>
    %cst_34 = arith.constant 1.000000e+00 : f32
    %72 = vector.broadcast %cst_34 : f32 to vector<2x32xf32>
    %73 = arith.addf %72, %71 : vector<2x32xf32>
    %74 = arith.divf %72, %73 : vector<2x32xf32>
    %75 = arith.index_cast %c1_i32 : i32 to index
    %c0_35 = arith.constant 0 : index
    %c0_36 = arith.constant 0 : index
    %76 = vector.load %arg2[%75, %c0_35, %c0_36] : memref<8x2x32xf32, #tpu.memory_space<vmem>>, vector<1x2x32xf32>
    %77 = vector.shape_cast %76 : vector<1x2x32xf32> to vector<2x32xf32>
    %78 = arith.addf %77, %62 : vector<2x32xf32>
    %79 = arith.negf %78 : vector<2x32xf32>
    %80 = math.exp %79 : vector<2x32xf32>
    %cst_37 = arith.constant 1.000000e+00 : f32
    %81 = vector.broadcast %cst_37 : f32 to vector<2x32xf32>
    %82 = arith.addf %81, %80 : vector<2x32xf32>
    %83 = arith.divf %81, %82 : vector<2x32xf32>
    %84 = arith.index_cast %c1_i32 : i32 to index
    %c0_38 = arith.constant 0 : index
    %c0_39 = arith.constant 0 : index
    %85 = vector.load %arg3[%84, %c0_38, %c0_39] : memref<8x2x32xf32, #tpu.memory_space<vmem>>, vector<1x2x32xf32>
    %86 = vector.shape_cast %85 : vector<1x2x32xf32> to vector<2x32xf32>
    %87 = arith.mulf %74, %65 : vector<2x32xf32>
    %88 = arith.addf %86, %87 : vector<2x32xf32>
    %89 = math.tanh %88 : vector<2x32xf32>
    %cst_40 = arith.constant 1.000000e+00 : f32
    %90 = vector.broadcast %cst_40 : f32 to vector<2x32xf32>
    %91 = arith.subf %90, %83 : vector<2x32xf32>
    %92 = arith.mulf %91, %89 : vector<2x32xf32>
    %93 = arith.mulf %83, %51 : vector<2x32xf32>
    %94 = arith.addf %92, %93 : vector<2x32xf32>
    %95 = arith.index_cast %c1_i32 : i32 to index
    %c0_41 = arith.constant 0 : index
    %c0_42 = arith.constant 0 : index
    %96 = vector.load %arg6[%95, %c0_41, %c0_42] : memref<8x2x32xf32, #tpu.memory_space<vmem>>, vector<1x2x32xf32>
    %97 = vector.shape_cast %96 : vector<1x2x32xf32> to vector<2x32xf32>
    %98 = vector.shape_cast %94 : vector<2x32xf32> to vector<1x2x32xf32>
    tpu.vector_store %arg6[%95, %c0_41, %c0_42], %98 {strides = array<i32>} : memref<8x2x32xf32, #tpu.memory_space<vmem>>, vector<1x2x32xf32>,
    %c2_i32 = arith.constant 2 : i32
    %99 = arith.truncf %94 : vector<2x32xf32> to vector<2x32xbf16>
    %cst_43 = arith.constant dense<0.000000e+00> : vector<2x32xf32>
    %100 = tpu.matmul %99, %1, %cst_43 {dimension_numbers = #tpu.dot_dimension_numbers<[1], [0], [0], [1], [0, 0, 1, 1], [], []>} : vector<2x32xbf16>, vector<32x32xbf16>, vector<2x32xf32> -> vector<2x32xf32>
    %101 = vector.broadcast %7 : vector<1x32xf32> to vector<2x32xf32>
    %102 = arith.addf %100, %101 : vector<2x32xf32>
    %cst_44 = arith.constant dense<0.000000e+00> : vector<2x32xf32>
    %103 = tpu.matmul %99, %3, %cst_44 {dimension_numbers = #tpu.dot_dimension_numbers<[1], [0], [0], [1], [0, 0, 1, 1], [], []>} : vector<2x32xbf16>, vector<32x32xbf16>, vector<2x32xf32> -> vector<2x32xf32>
    %104 = vector.broadcast %9 : vector<1x32xf32> to vector<2x32xf32>
    %105 = arith.addf %103, %104 : vector<2x32xf32>
    %cst_45 = arith.constant dense<0.000000e+00> : vector<2x32xf32>
    %106 = tpu.matmul %99, %5, %cst_45 {dimension_numbers = #tpu.dot_dimension_numbers<[1], [0], [0], [1], [0, 0, 1, 1], [], []>} : vector<2x32xbf16>, vector<32x32xbf16>, vector<2x32xf32> -> vector<2x32xf32>
    %107 = vector.broadcast %11 : vector<1x32xf32> to vector<2x32xf32>
    %108 = arith.addf %106, %107 : vector<2x32xf32>
    %109 = arith.index_cast %c2_i32 : i32 to index
    %c0_46 = arith.constant 0 : index
    %c0_47 = arith.constant 0 : index
    %110 = vector.load %arg1[%109, %c0_46, %c0_47] : memref<8x2x32xf32, #tpu.memory_space<vmem>>, vector<1x2x32xf32>
    %111 = vector.shape_cast %110 : vector<1x2x32xf32> to vector<2x32xf32>
    %112 = arith.addf %111, %102 : vector<2x32xf32>
    %113 = arith.negf %112 : vector<2x32xf32>
    %114 = math.exp %113 : vector<2x32xf32>
    %cst_48 = arith.constant 1.000000e+00 : f32
    %115 = vector.broadcast %cst_48 : f32 to vector<2x32xf32>
    %116 = arith.addf %115, %114 : vector<2x32xf32>
    %117 = arith.divf %115, %116 : vector<2x32xf32>
    %118 = arith.index_cast %c2_i32 : i32 to index
    %c0_49 = arith.constant 0 : index
    %c0_50 = arith.constant 0 : index
    %119 = vector.load %arg2[%118, %c0_49, %c0_50] : memref<8x2x32xf32, #tpu.memory_space<vmem>>, vector<1x2x32xf32>
    %120 = vector.shape_cast %119 : vector<1x2x32xf32> to vector<2x32xf32>
    %121 = arith.addf %120, %105 : vector<2x32xf32>
    %122 = arith.negf %121 : vector<2x32xf32>
    %123 = math.exp %122 : vector<2x32xf32>
    %cst_51 = arith.constant 1.000000e+00 : f32
    %124 = vector.broadcast %cst_51 : f32 to vector<2x32xf32>
    %125 = arith.addf %124, %123 : vector<2x32xf32>
    %126 = arith.divf %124, %125 : vector<2x32xf32>
    %127 = arith.index_cast %c2_i32 : i32 to index
    %c0_52 = arith.constant 0 : index
    %c0_53 = arith.constant 0 : index
    %128 = vector.load %arg3[%127, %c0_52, %c0_53] : memref<8x2x32xf32, #tpu.memory_space<vmem>>, vector<1x2x32xf32>
    %129 = vector.shape_cast %128 : vector<1x2x32xf32> to vector<2x32xf32>
    %130 = arith.mulf %117, %108 : vector<2x32xf32>
    %131 = arith.addf %129, %130 : vector<2x32xf32>
    %132 = math.tanh %131 : vector<2x32xf32>
    %cst_54 = arith.constant 1.000000e+00 : f32
    %133 = vector.broadcast %cst_54 : f32 to vector<2x32xf32>
    %134 = arith.subf %133, %126 : vector<2x32xf32>
    %135 = arith.mulf %134, %132 : vector<2x32xf32>
    %136 = arith.mulf %126, %94 : vector<2x32xf32>
    %137 = arith.addf %135, %136 : vector<2x32xf32>
    %138 = arith.index_cast %c2_i32 : i32 to index
    %c0_55 = arith.constant 0 : index
    %c0_56 = arith.constant 0 : index
    %139 = vector.load %arg6[%138, %c0_55, %c0_56] : memref<8x2x32xf32, #tpu.memory_space<vmem>>, vector<1x2x32xf32>
    %140 = vector.shape_cast %139 : vector<1x2x32xf32> to vector<2x32xf32>
    %141 = vector.shape_cast %137 : vector<2x32xf32> to vector<1x2x32xf32>
    tpu.vector_store %arg6[%138, %c0_55, %c0_56], %141 {strides = array<i32>} : memref<8x2x32xf32, #tpu.memory_space<vmem>>, vector<1x2x32xf32>,
    %c3_i32 = arith.constant 3 : i32
    %142 = arith.truncf %137 : vector<2x32xf32> to vector<2x32xbf16>
    %cst_57 = arith.constant dense<0.000000e+00> : vector<2x32xf32>
    %143 = tpu.matmul %142, %1, %cst_57 {dimension_numbers = #tpu.dot_dimension_numbers<[1], [0], [0], [1], [0, 0, 1, 1], [], []>} : vector<2x32xbf16>, vector<32x32xbf16>, vector<2x32xf32> -> vector<2x32xf32>
    %144 = vector.broadcast %7 : vector<1x32xf32> to vector<2x32xf32>
    %145 = arith.addf %143, %144 : vector<2x32xf32>
    %cst_58 = arith.constant dense<0.000000e+00> : vector<2x32xf32>
    %146 = tpu.matmul %142, %3, %cst_58 {dimension_numbers = #tpu.dot_dimension_numbers<[1], [0], [0], [1], [0, 0, 1, 1], [], []>} : vector<2x32xbf16>, vector<32x32xbf16>, vector<2x32xf32> -> vector<2x32xf32>
    %147 = vector.broadcast %9 : vector<1x32xf32> to vector<2x32xf32>
    %148 = arith.addf %146, %147 : vector<2x32xf32>
    %cst_59 = arith.constant dense<0.000000e+00> : vector<2x32xf32>
    %149 = tpu.matmul %142, %5, %cst_59 {dimension_numbers = #tpu.dot_dimension_numbers<[1], [0], [0], [1], [0, 0, 1, 1], [], []>} : vector<2x32xbf16>, vector<32x32xbf16>, vector<2x32xf32> -> vector<2x32xf32>
    %150 = vector.broadcast %11 : vector<1x32xf32> to vector<2x32xf32>
    %151 = arith.addf %149, %150 : vector<2x32xf32>
    %152 = arith.index_cast %c3_i32 : i32 to index
    %c0_60 = arith.constant 0 : index
    %c0_61 = arith.constant 0 : index
    %153 = vector.load %arg1[%152, %c0_60, %c0_61] : memref<8x2x32xf32, #tpu.memory_space<vmem>>, vector<1x2x32xf32>
    %154 = vector.shape_cast %153 : vector<1x2x32xf32> to vector<2x32xf32>
    %155 = arith.addf %154, %145 : vector<2x32xf32>
    %156 = arith.negf %155 : vector<2x32xf32>
    %157 = math.exp %156 : vector<2x32xf32>
    %cst_62 = arith.constant 1.000000e+00 : f32
    %158 = vector.broadcast %cst_62 : f32 to vector<2x32xf32>
    %159 = arith.addf %158, %157 : vector<2x32xf32>
    %160 = arith.divf %158, %159 : vector<2x32xf32>
    %161 = arith.index_cast %c3_i32 : i32 to index
    %c0_63 = arith.constant 0 : index
    %c0_64 = arith.constant 0 : index
    %162 = vector.load %arg2[%161, %c0_63, %c0_64] : memref<8x2x32xf32, #tpu.memory_space<vmem>>, vector<1x2x32xf32>
    %163 = vector.shape_cast %162 : vector<1x2x32xf32> to vector<2x32xf32>
    %164 = arith.addf %163, %148 : vector<2x32xf32>
    %165 = arith.negf %164 : vector<2x32xf32>
    %166 = math.exp %165 : vector<2x32xf32>
    %cst_65 = arith.constant 1.000000e+00 : f32
    %167 = vector.broadcast %cst_65 : f32 to vector<2x32xf32>
    %168 = arith.addf %167, %166 : vector<2x32xf32>
    %169 = arith.divf %167, %168 : vector<2x32xf32>
    %170 = arith.index_cast %c3_i32 : i32 to index
    %c0_66 = arith.constant 0 : index
    %c0_67 = arith.constant 0 : index
    %171 = vector.load %arg3[%170, %c0_66, %c0_67] : memref<8x2x32xf32, #tpu.memory_space<vmem>>, vector<1x2x32xf32>
    %172 = vector.shape_cast %171 : vector<1x2x32xf32> to vector<2x32xf32>
    %173 = arith.mulf %160, %151 : vector<2x32xf32>
    %174 = arith.addf %172, %173 : vector<2x32xf32>
    %175 = math.tanh %174 : vector<2x32xf32>
    %cst_68 = arith.constant 1.000000e+00 : f32
    %176 = vector.broadcast %cst_68 : f32 to vector<2x32xf32>
    %177 = arith.subf %176, %169 : vector<2x32xf32>
    %178 = arith.mulf %177, %175 : vector<2x32xf32>
    %179 = arith.mulf %169, %137 : vector<2x32xf32>
    %180 = arith.addf %178, %179 : vector<2x32xf32>
    %181 = arith.index_cast %c3_i32 : i32 to index
    %c0_69 = arith.constant 0 : index
    %c0_70 = arith.constant 0 : index
    %182 = vector.load %arg6[%181, %c0_69, %c0_70] : memref<8x2x32xf32, #tpu.memory_space<vmem>>, vector<1x2x32xf32>
    %183 = vector.shape_cast %182 : vector<1x2x32xf32> to vector<2x32xf32>
    %184 = vector.shape_cast %180 : vector<2x32xf32> to vector<1x2x32xf32>
    tpu.vector_store %arg6[%181, %c0_69, %c0_70], %184 {strides = array<i32>} : memref<8x2x32xf32, #tpu.memory_space<vmem>>, vector<1x2x32xf32>,
    %c4_i32 = arith.constant 4 : i32
    %185 = arith.truncf %180 : vector<2x32xf32> to vector<2x32xbf16>
    %cst_71 = arith.constant dense<0.000000e+00> : vector<2x32xf32>
    %186 = tpu.matmul %185, %1, %cst_71 {dimension_numbers = #tpu.dot_dimension_numbers<[1], [0], [0], [1], [0, 0, 1, 1], [], []>} : vector<2x32xbf16>, vector<32x32xbf16>, vector<2x32xf32> -> vector<2x32xf32>
    %187 = vector.broadcast %7 : vector<1x32xf32> to vector<2x32xf32>
    %188 = arith.addf %186, %187 : vector<2x32xf32>
    %cst_72 = arith.constant dense<0.000000e+00> : vector<2x32xf32>
    %189 = tpu.matmul %185, %3, %cst_72 {dimension_numbers = #tpu.dot_dimension_numbers<[1], [0], [0], [1], [0, 0, 1, 1], [], []>} : vector<2x32xbf16>, vector<32x32xbf16>, vector<2x32xf32> -> vector<2x32xf32>
    %190 = vector.broadcast %9 : vector<1x32xf32> to vector<2x32xf32>
    %191 = arith.addf %189, %190 : vector<2x32xf32>
    %cst_73 = arith.constant dense<0.000000e+00> : vector<2x32xf32>
    %192 = tpu.matmul %185, %5, %cst_73 {dimension_numbers = #tpu.dot_dimension_numbers<[1], [0], [0], [1], [0, 0, 1, 1], [], []>} : vector<2x32xbf16>, vector<32x32xbf16>, vector<2x32xf32> -> vector<2x32xf32>
    %193 = vector.broadcast %11 : vector<1x32xf32> to vector<2x32xf32>
    %194 = arith.addf %192, %193 : vector<2x32xf32>
    %195 = arith.index_cast %c4_i32 : i32 to index
    %c0_74 = arith.constant 0 : index
    %c0_75 = arith.constant 0 : index
    %196 = vector.load %arg1[%195, %c0_74, %c0_75] : memref<8x2x32xf32, #tpu.memory_space<vmem>>, vector<1x2x32xf32>
    %197 = vector.shape_cast %196 : vector<1x2x32xf32> to vector<2x32xf32>
    %198 = arith.addf %197, %188 : vector<2x32xf32>
    %199 = arith.negf %198 : vector<2x32xf32>
    %200 = math.exp %199 : vector<2x32xf32>
    %cst_76 = arith.constant 1.000000e+00 : f32
    %201 = vector.broadcast %cst_76 : f32 to vector<2x32xf32>
    %202 = arith.addf %201, %200 : vector<2x32xf32>
    %203 = arith.divf %201, %202 : vector<2x32xf32>
    %204 = arith.index_cast %c4_i32 : i32 to index
    %c0_77 = arith.constant 0 : index
    %c0_78 = arith.constant 0 : index
    %205 = vector.load %arg2[%204, %c0_77, %c0_78] : memref<8x2x32xf32, #tpu.memory_space<vmem>>, vector<1x2x32xf32>
    %206 = vector.shape_cast %205 : vector<1x2x32xf32> to vector<2x32xf32>
    %207 = arith.addf %206, %191 : vector<2x32xf32>
    %208 = arith.negf %207 : vector<2x32xf32>
    %209 = math.exp %208 : vector<2x32xf32>
    %cst_79 = arith.constant 1.000000e+00 : f32
    %210 = vector.broadcast %cst_79 : f32 to vector<2x32xf32>
    %211 = arith.addf %210, %209 : vector<2x32xf32>
    %212 = arith.divf %210, %211 : vector<2x32xf32>
    %213 = arith.index_cast %c4_i32 : i32 to index
    %c0_80 = arith.constant 0 : index
    %c0_81 = arith.constant 0 : index
    %214 = vector.load %arg3[%213, %c0_80, %c0_81] : memref<8x2x32xf32, #tpu.memory_space<vmem>>, vector<1x2x32xf32>
    %215 = vector.shape_cast %214 : vector<1x2x32xf32> to vector<2x32xf32>
    %216 = arith.mulf %203, %194 : vector<2x32xf32>
    %217 = arith.addf %215, %216 : vector<2x32xf32>
    %218 = math.tanh %217 : vector<2x32xf32>
    %cst_82 = arith.constant 1.000000e+00 : f32
    %219 = vector.broadcast %cst_82 : f32 to vector<2x32xf32>
    %220 = arith.subf %219, %212 : vector<2x32xf32>
    %221 = arith.mulf %220, %218 : vector<2x32xf32>
    %222 = arith.mulf %212, %180 : vector<2x32xf32>
    %223 = arith.addf %221, %222 : vector<2x32xf32>
    %224 = arith.index_cast %c4_i32 : i32 to index
    %c0_83 = arith.constant 0 : index
    %c0_84 = arith.constant 0 : index
    %225 = vector.load %arg6[%224, %c0_83, %c0_84] : memref<8x2x32xf32, #tpu.memory_space<vmem>>, vector<1x2x32xf32>
    %226 = vector.shape_cast %225 : vector<1x2x32xf32> to vector<2x32xf32>
    %227 = vector.shape_cast %223 : vector<2x32xf32> to vector<1x2x32xf32>
    tpu.vector_store %arg6[%224, %c0_83, %c0_84], %227 {strides = array<i32>} : memref<8x2x32xf32, #tpu.memory_space<vmem>>, vector<1x2x32xf32>,
    %c5_i32 = arith.constant 5 : i32
    %228 = arith.truncf %223 : vector<2x32xf32> to vector<2x32xbf16>
    %cst_85 = arith.constant dense<0.000000e+00> : vector<2x32xf32>
    %229 = tpu.matmul %228, %1, %cst_85 {dimension_numbers = #tpu.dot_dimension_numbers<[1], [0], [0], [1], [0, 0, 1, 1], [], []>} : vector<2x32xbf16>, vector<32x32xbf16>, vector<2x32xf32> -> vector<2x32xf32>
    %230 = vector.broadcast %7 : vector<1x32xf32> to vector<2x32xf32>
    %231 = arith.addf %229, %230 : vector<2x32xf32>
    %cst_86 = arith.constant dense<0.000000e+00> : vector<2x32xf32>
    %232 = tpu.matmul %228, %3, %cst_86 {dimension_numbers = #tpu.dot_dimension_numbers<[1], [0], [0], [1], [0, 0, 1, 1], [], []>} : vector<2x32xbf16>, vector<32x32xbf16>, vector<2x32xf32> -> vector<2x32xf32>
    %233 = vector.broadcast %9 : vector<1x32xf32> to vector<2x32xf32>
    %234 = arith.addf %232, %233 : vector<2x32xf32>
    %cst_87 = arith.constant dense<0.000000e+00> : vector<2x32xf32>
    %235 = tpu.matmul %228, %5, %cst_87 {dimension_numbers = #tpu.dot_dimension_numbers<[1], [0], [0], [1], [0, 0, 1, 1], [], []>} : vector<2x32xbf16>, vector<32x32xbf16>, vector<2x32xf32> -> vector<2x32xf32>
    %236 = vector.broadcast %11 : vector<1x32xf32> to vector<2x32xf32>
    %237 = arith.addf %235, %236 : vector<2x32xf32>
    %238 = arith.index_cast %c5_i32 : i32 to index
    %c0_88 = arith.constant 0 : index
    %c0_89 = arith.constant 0 : index
    %239 = vector.load %arg1[%238, %c0_88, %c0_89] : memref<8x2x32xf32, #tpu.memory_space<vmem>>, vector<1x2x32xf32>
    %240 = vector.shape_cast %239 : vector<1x2x32xf32> to vector<2x32xf32>
    %241 = arith.addf %240, %231 : vector<2x32xf32>
    %242 = arith.negf %241 : vector<2x32xf32>
    %243 = math.exp %242 : vector<2x32xf32>
    %cst_90 = arith.constant 1.000000e+00 : f32
    %244 = vector.broadcast %cst_90 : f32 to vector<2x32xf32>
    %245 = arith.addf %244, %243 : vector<2x32xf32>
    %246 = arith.divf %244, %245 : vector<2x32xf32>
    %247 = arith.index_cast %c5_i32 : i32 to index
    %c0_91 = arith.constant 0 : index
    %c0_92 = arith.constant 0 : index
    %248 = vector.load %arg2[%247, %c0_91, %c0_92] : memref<8x2x32xf32, #tpu.memory_space<vmem>>, vector<1x2x32xf32>
    %249 = vector.shape_cast %248 : vector<1x2x32xf32> to vector<2x32xf32>
    %250 = arith.addf %249, %234 : vector<2x32xf32>
    %251 = arith.negf %250 : vector<2x32xf32>
    %252 = math.exp %251 : vector<2x32xf32>
    %cst_93 = arith.constant 1.000000e+00 : f32
    %253 = vector.broadcast %cst_93 : f32 to vector<2x32xf32>
    %254 = arith.addf %253, %252 : vector<2x32xf32>
    %255 = arith.divf %253, %254 : vector<2x32xf32>
    %256 = arith.index_cast %c5_i32 : i32 to index
    %c0_94 = arith.constant 0 : index
    %c0_95 = arith.constant 0 : index
    %257 = vector.load %arg3[%256, %c0_94, %c0_95] : memref<8x2x32xf32, #tpu.memory_space<vmem>>, vector<1x2x32xf32>
    %258 = vector.shape_cast %257 : vector<1x2x32xf32> to vector<2x32xf32>
    %259 = arith.mulf %246, %237 : vector<2x32xf32>
    %260 = arith.addf %258, %259 : vector<2x32xf32>
    %261 = math.tanh %260 : vector<2x32xf32>
    %cst_96 = arith.constant 1.000000e+00 : f32
    %262 = vector.broadcast %cst_96 : f32 to vector<2x32xf32>
    %263 = arith.subf %262, %255 : vector<2x32xf32>
    %264 = arith.mulf %263, %261 : vector<2x32xf32>
    %265 = arith.mulf %255, %223 : vector<2x32xf32>
    %266 = arith.addf %264, %265 : vector<2x32xf32>
    %267 = arith.index_cast %c5_i32 : i32 to index
    %c0_97 = arith.constant 0 : index
    %c0_98 = arith.constant 0 : index
    %268 = vector.load %arg6[%267, %c0_97, %c0_98] : memref<8x2x32xf32, #tpu.memory_space<vmem>>, vector<1x2x32xf32>
    %269 = vector.shape_cast %268 : vector<1x2x32xf32> to vector<2x32xf32>
    %270 = vector.shape_cast %266 : vector<2x32xf32> to vector<1x2x32xf32>
    tpu.vector_store %arg6[%267, %c0_97, %c0_98], %270 {strides = array<i32>} : memref<8x2x32xf32, #tpu.memory_space<vmem>>, vector<1x2x32xf32>,
    %c6_i32 = arith.constant 6 : i32
    %271 = arith.truncf %266 : vector<2x32xf32> to vector<2x32xbf16>
    %cst_99 = arith.constant dense<0.000000e+00> : vector<2x32xf32>
    %272 = tpu.matmul %271, %1, %cst_99 {dimension_numbers = #tpu.dot_dimension_numbers<[1], [0], [0], [1], [0, 0, 1, 1], [], []>} : vector<2x32xbf16>, vector<32x32xbf16>, vector<2x32xf32> -> vector<2x32xf32>
    %273 = vector.broadcast %7 : vector<1x32xf32> to vector<2x32xf32>
    %274 = arith.addf %272, %273 : vector<2x32xf32>
    %cst_100 = arith.constant dense<0.000000e+00> : vector<2x32xf32>
    %275 = tpu.matmul %271, %3, %cst_100 {dimension_numbers = #tpu.dot_dimension_numbers<[1], [0], [0], [1], [0, 0, 1, 1], [], []>} : vector<2x32xbf16>, vector<32x32xbf16>, vector<2x32xf32> -> vector<2x32xf32>
    %276 = vector.broadcast %9 : vector<1x32xf32> to vector<2x32xf32>
    %277 = arith.addf %275, %276 : vector<2x32xf32>
    %cst_101 = arith.constant dense<0.000000e+00> : vector<2x32xf32>
    %278 = tpu.matmul %271, %5, %cst_101 {dimension_numbers = #tpu.dot_dimension_numbers<[1], [0], [0], [1], [0, 0, 1, 1], [], []>} : vector<2x32xbf16>, vector<32x32xbf16>, vector<2x32xf32> -> vector<2x32xf32>
    %279 = vector.broadcast %11 : vector<1x32xf32> to vector<2x32xf32>
    %280 = arith.addf %278, %279 : vector<2x32xf32>
    %281 = arith.index_cast %c6_i32 : i32 to index
    %c0_102 = arith.constant 0 : index
    %c0_103 = arith.constant 0 : index
    %282 = vector.load %arg1[%281, %c0_102, %c0_103] : memref<8x2x32xf32, #tpu.memory_space<vmem>>, vector<1x2x32xf32>
    %283 = vector.shape_cast %282 : vector<1x2x32xf32> to vector<2x32xf32>
    %284 = arith.addf %283, %274 : vector<2x32xf32>
    %285 = arith.negf %284 : vector<2x32xf32>
    %286 = math.exp %285 : vector<2x32xf32>
    %cst_104 = arith.constant 1.000000e+00 : f32
    %287 = vector.broadcast %cst_104 : f32 to vector<2x32xf32>
    %288 = arith.addf %287, %286 : vector<2x32xf32>
    %289 = arith.divf %287, %288 : vector<2x32xf32>
    %290 = arith.index_cast %c6_i32 : i32 to index
    %c0_105 = arith.constant 0 : index
    %c0_106 = arith.constant 0 : index
    %291 = vector.load %arg2[%290, %c0_105, %c0_106] : memref<8x2x32xf32, #tpu.memory_space<vmem>>, vector<1x2x32xf32>
    %292 = vector.shape_cast %291 : vector<1x2x32xf32> to vector<2x32xf32>
    %293 = arith.addf %292, %277 : vector<2x32xf32>
    %294 = arith.negf %293 : vector<2x32xf32>
    %295 = math.exp %294 : vector<2x32xf32>
    %cst_107 = arith.constant 1.000000e+00 : f32
    %296 = vector.broadcast %cst_107 : f32 to vector<2x32xf32>
    %297 = arith.addf %296, %295 : vector<2x32xf32>
    %298 = arith.divf %296, %297 : vector<2x32xf32>
    %299 = arith.index_cast %c6_i32 : i32 to index
    %c0_108 = arith.constant 0 : index
    %c0_109 = arith.constant 0 : index
    %300 = vector.load %arg3[%299, %c0_108, %c0_109] : memref<8x2x32xf32, #tpu.memory_space<vmem>>, vector<1x2x32xf32>
    %301 = vector.shape_cast %300 : vector<1x2x32xf32> to vector<2x32xf32>
    %302 = arith.mulf %289, %280 : vector<2x32xf32>
    %303 = arith.addf %301, %302 : vector<2x32xf32>
    %304 = math.tanh %303 : vector<2x32xf32>
    %cst_110 = arith.constant 1.000000e+00 : f32
    %305 = vector.broadcast %cst_110 : f32 to vector<2x32xf32>
    %306 = arith.subf %305, %298 : vector<2x32xf32>
    %307 = arith.mulf %306, %304 : vector<2x32xf32>
    %308 = arith.mulf %298, %266 : vector<2x32xf32>
    %309 = arith.addf %307, %308 : vector<2x32xf32>
    %310 = arith.index_cast %c6_i32 : i32 to index
    %c0_111 = arith.constant 0 : index
    %c0_112 = arith.constant 0 : index
    %311 = vector.load %arg6[%310, %c0_111, %c0_112] : memref<8x2x32xf32, #tpu.memory_space<vmem>>, vector<1x2x32xf32>
    %312 = vector.shape_cast %311 : vector<1x2x32xf32> to vector<2x32xf32>
    %313 = vector.shape_cast %309 : vector<2x32xf32> to vector<1x2x32xf32>
    tpu.vector_store %arg6[%310, %c0_111, %c0_112], %313 {strides = array<i32>} : memref<8x2x32xf32, #tpu.memory_space<vmem>>, vector<1x2x32xf32>,
    %c7_i32 = arith.constant 7 : i32
    %314 = arith.truncf %309 : vector<2x32xf32> to vector<2x32xbf16>
    %cst_113 = arith.constant dense<0.000000e+00> : vector<2x32xf32>
    %315 = tpu.matmul %314, %1, %cst_113 {dimension_numbers = #tpu.dot_dimension_numbers<[1], [0], [0], [1], [0, 0, 1, 1], [], []>} : vector<2x32xbf16>, vector<32x32xbf16>, vector<2x32xf32> -> vector<2x32xf32>
    %316 = vector.broadcast %7 : vector<1x32xf32> to vector<2x32xf32>
    %317 = arith.addf %315, %316 : vector<2x32xf32>
    %cst_114 = arith.constant dense<0.000000e+00> : vector<2x32xf32>
    %318 = tpu.matmul %314, %3, %cst_114 {dimension_numbers = #tpu.dot_dimension_numbers<[1], [0], [0], [1], [0, 0, 1, 1], [], []>} : vector<2x32xbf16>, vector<32x32xbf16>, vector<2x32xf32> -> vector<2x32xf32>
    %319 = vector.broadcast %9 : vector<1x32xf32> to vector<2x32xf32>
    %320 = arith.addf %318, %319 : vector<2x32xf32>
    %cst_115 = arith.constant dense<0.000000e+00> : vector<2x32xf32>
    %321 = tpu.matmul %314, %5, %cst_115 {dimension_numbers = #tpu.dot_dimension_numbers<[1], [0], [0], [1], [0, 0, 1, 1], [], []>} : vector<2x32xbf16>, vector<32x32xbf16>, vector<2x32xf32> -> vector<2x32xf32>
    %322 = vector.broadcast %11 : vector<1x32xf32> to vector<2x32xf32>
    %323 = arith.addf %321, %322 : vector<2x32xf32>
    %324 = arith.index_cast %c7_i32 : i32 to index
    %c0_116 = arith.constant 0 : index
    %c0_117 = arith.constant 0 : index
    %325 = vector.load %arg1[%324, %c0_116, %c0_117] : memref<8x2x32xf32, #tpu.memory_space<vmem>>, vector<1x2x32xf32>
    %326 = vector.shape_cast %325 : vector<1x2x32xf32> to vector<2x32xf32>
    %327 = arith.addf %326, %317 : vector<2x32xf32>
    %328 = arith.negf %327 : vector<2x32xf32>
    %329 = math.exp %328 : vector<2x32xf32>
    %cst_118 = arith.constant 1.000000e+00 : f32
    %330 = vector.broadcast %cst_118 : f32 to vector<2x32xf32>
    %331 = arith.addf %330, %329 : vector<2x32xf32>
    %332 = arith.divf %330, %331 : vector<2x32xf32>
    %333 = arith.index_cast %c7_i32 : i32 to index
    %c0_119 = arith.constant 0 : index
    %c0_120 = arith.constant 0 : index
    %334 = vector.load %arg2[%333, %c0_119, %c0_120] : memref<8x2x32xf32, #tpu.memory_space<vmem>>, vector<1x2x32xf32>
    %335 = vector.shape_cast %334 : vector<1x2x32xf32> to vector<2x32xf32>
    %336 = arith.addf %335, %320 : vector<2x32xf32>
    %337 = arith.negf %336 : vector<2x32xf32>
    %338 = math.exp %337 : vector<2x32xf32>
    %cst_121 = arith.constant 1.000000e+00 : f32
    %339 = vector.broadcast %cst_121 : f32 to vector<2x32xf32>
    %340 = arith.addf %339, %338 : vector<2x32xf32>
    %341 = arith.divf %339, %340 : vector<2x32xf32>
    %342 = arith.index_cast %c7_i32 : i32 to index
    %c0_122 = arith.constant 0 : index
    %c0_123 = arith.constant 0 : index
    %343 = vector.load %arg3[%342, %c0_122, %c0_123] : memref<8x2x32xf32, #tpu.memory_space<vmem>>, vector<1x2x32xf32>
    %344 = vector.shape_cast %343 : vector<1x2x32xf32> to vector<2x32xf32>
    %345 = arith.mulf %332, %323 : vector<2x32xf32>
    %346 = arith.addf %344, %345 : vector<2x32xf32>
    %347 = math.tanh %346 : vector<2x32xf32>
    %cst_124 = arith.constant 1.000000e+00 : f32
    %348 = vector.broadcast %cst_124 : f32 to vector<2x32xf32>
    %349 = arith.subf %348, %341 : vector<2x32xf32>
    %350 = arith.mulf %349, %347 : vector<2x32xf32>
    %351 = arith.mulf %341, %309 : vector<2x32xf32>
    %352 = arith.addf %350, %351 : vector<2x32xf32>
    %353 = arith.index_cast %c7_i32 : i32 to index
    %c0_125 = arith.constant 0 : index
    %c0_126 = arith.constant 0 : index
    %354 = vector.load %arg6[%353, %c0_125, %c0_126] : memref<8x2x32xf32, #tpu.memory_space<vmem>>, vector<1x2x32xf32>
    %355 = vector.shape_cast %354 : vector<1x2x32xf32> to vector<2x32xf32>
    %356 = vector.shape_cast %352 : vector<2x32xf32> to vector<1x2x32xf32>
    tpu.vector_store %arg6[%353, %c0_125, %c0_126], %356 {strides = array<i32>} : memref<8x2x32xf32, #tpu.memory_space<vmem>>, vector<1x2x32xf32>,
    %c8_i32 = arith.constant 8 : i32
    %c0_127 = arith.constant 0 : index
    %c0_128 = arith.constant 0 : index
    %c0_129 = arith.constant 0 : index
    %357 = vector.load %arg7[%c0_127, %c0_128, %c0_129] : memref<1x2x32xf32, #tpu.memory_space<vmem>>, vector<1x2x32xf32>
    %358 = vector.shape_cast %357 : vector<1x2x32xf32> to vector<2x32xf32>
    %359 = vector.shape_cast %352 : vector<2x32xf32> to vector<1x2x32xf32>
    tpu.vector_store %arg7[%c0_127, %c0_128, %c0_129], %359 {strides = array<i32>} : memref<1x2x32xf32, #tpu.memory_space<vmem>>, vector<1x2x32xf32>,
    return
  }
  func.func @transform_0(%arg0: i32) -> (i32, i32, i32) {
    %c0_i32 = arith.constant 0 : i32
    %c0_i32_0 = arith.constant 0 : i32
    %c0_i32_1 = arith.constant 0 : i32
    return %c0_i32, %arg0, %c0_i32_0 : i32, i32, i32
  }
  func.func @transform_1(%arg0: i32) -> (i32, i32, i32) {
    %c0_i32 = arith.constant 0 : i32
    %c0_i32_0 = arith.constant 0 : i32
    %c0_i32_1 = arith.constant 0 : i32
    return %c0_i32, %arg0, %c0_i32_0 : i32, i32, i32
  }
  func.func @transform_2(%arg0: i32) -> (i32, i32, i32) {
    %c0_i32 = arith.constant 0 : i32
    %c0_i32_0 = arith.constant 0 : i32
    %c0_i32_1 = arith.constant 0 : i32
    return %c0_i32, %arg0, %c0_i32_0 : i32, i32, i32
  }
  func.func @transform_3(%arg0: i32) -> (i32, i32, i32) {
    %c0_i32 = arith.constant 0 : i32
    %c0_i32_0 = arith.constant 0 : i32
    %c0_i32_1 = arith.constant 0 : i32
    %c0_i32_2 = arith.constant 0 : i32
    return %c0_i32, %c0_i32_0, %c0_i32_1 : i32, i32, i32
  }
  func.func @transform_4(%arg0: i32) -> (i32, i32, i32) {
    %c0_i32 = arith.constant 0 : i32
    %c0_i32_0 = arith.constant 0 : i32
    %c0_i32_1 = arith.constant 0 : i32
    %c0_i32_2 = arith.constant 0 : i32
    return %c0_i32, %c0_i32_0, %c0_i32_1 : i32, i32, i32
  }
  func.func @transform_5(%arg0: i32) -> (i32, i32, i32) {
    %c0_i32 = arith.constant 0 : i32
    %c0_i32_0 = arith.constant 0 : i32
    %c0_i32_1 = arith.constant 0 : i32
    return %c0_i32, %arg0, %c0_i32_0 : i32, i32, i32
  }
  func.func @transform_6(%arg0: i32) -> (i32, i32, i32) {
    %c0_i32 = arith.constant 0 : i32
    %c0_i32_0 = arith.constant 0 : i32
    %c0_i32_1 = arith.constant 0 : i32
    return %c0_i32, %arg0, %c0_i32_0 : i32, i32, i32
  }
}

</mosaic_0001>

<bundles_post_ra>
// kernel: encoder_rnn_forward.1
= control target key start
LH: loop header
LB: loop body
LE: loop exit
PB: predicated region body
PF: predicated region fallthrough
CT: control target
= control target key end

     0   :  { %v1799_v1 = vmov 0.0   ;;  %vm1800_vm0 = vmmov 0   ;;  %s2189_s0 = inlined_call_operand.vmem [shape: f32[8,2,32], index: 0, kind: input, shape index: {}]   ;;  %s2190_s1 = inlined_call_operand.vmem [shape: f32[8,2,32], index: 1, kind: input, shape index: {}]   ;;  %s2191_s2 = inlined_call_operand.vmem [shape: f32[8,2,32], index: 2, kind: input, shape index: {}]   ;;  %s2192_s3 = inlined_call_operand.vmem [shape: bf16[3,32,32], index: 3, kind: input, shape index: {}]   ;;  %s2193_s4 = inlined_call_operand.vmem [shape: f32[3,1,32], index: 4, kind: input, shape index: {}]   ;;  %s2194_s5 = inlined_call_operand.vmem [shape: f32[8,2,32], index: 5, kind: output, shape index: {0}]   ;;  %s2195_s6 = inlined_call_operand.hbm [shape: f32[1,2,32], index: 6, kind: output, shape index: {1}]  }
   0x1   :  { %v1841_v0 = vld [vmem:[%s2192_s3] sm:$0xff]   ;;  %1493 = vmatprep.subr.bf16.mxu0 %v1799_v1  ;;  %v1847_v2 = vld [vmem:[%s2192_s3 + $0x8] sm:$0xff]   ;;  %1501 = vmatprep.subr.bf16.mxu1 %v1799_v1  ;;  %v1856_v3 = vld [vmem:[%s2192_s3 + $0x10] sm:$0xff]  }
   0x2   :  { %1494 = vmatpush3.bf16.msra.mxu0 %v1841_v0  ;;  %1497 = vmatprep.mubr.msk.bf16.mxu0 %vm1800_vm0, %v1799_v1  ;;  %v1865_v4 = vld [vmem:[%s2192_s3 + $0x18] sm:$0xff]   ;;  %v1872_v5 = vld [vmem:[%s2192_s3 + $0x20] sm:$0xff]  }
   0x3   :  { %1495 = vmatprep.subr.bf16.mxu0 %v1799_v1  ;;  %1505 = vmatprep.mubr.msk.bf16.mxu1 %vm1800_vm0, %v1799_v1 }
   0x4   :  { %1502 = vmatpush3.bf16.msra.mxu1 %v1856_v3 }
   0x5   :  { %1503 = vmatprep.subr.bf16.mxu1 %v1799_v1 }
   0x6   :  { %1496 = vmatpush3.bf16.msra.mxu0 %v1847_v2 }
   0x7   :  { %12 = vsyncpa [#allocation3], 0  ;;  %1509 = vmatprep.subr.bf16.mxu0 %v1799_v1  ;;  %v1801_v6 = vmov 0   ;;  %v1881_v7 = vld [vmem:[%s2192_s3 + $0x28] sm:$0xff]   ;;  %v1903_v8 = vld [vmem:[%s2193_s4] ss:$0 sm:$0xff] }
   0x8   :  { %1504 = vmatpush3.bf16.msra.mxu1 %v1865_v4  ;;  %v221_v10 = vld [vmem:[%s2189_s0] sm:$0x3]  ;;  %v1921_v33 = vld [vmem:[%s2193_s4 + $0x2] ss:$0 sm:$0xff]  ;;  %vm245_vm1 = vcmask 254976   ;;  %vm61_vm2 = vcmask 261120  }
   0x9   :  { %1498 = vmatmul.mubr.bf16.vlgmr.msra.gmra.mrb[0].mxu0 %v1801_v6  ;;  %1517 = vmatprep.subr.bf16.mxu1 %v1799_v1  ;;  %v1911_v11 = vld [vmem:[%s2193_s4 + $0x1] ss:$0 sm:$0xff]  ;;  %v1361_v48 = vld [vmem:[%s2189_s0 + $0x2] sm:$0x3]  ;;  %s1802_s21 = smov [#allocation2]  }
   0xa   :  { %1510 = vmatpush3.bf16.msra.mxu0 %v1872_v5  ;;  %1513 = vmatprep.mubr.msk.bf16.mxu0 %vm1800_vm0, %v1799_v1  ;;  %v229_v16 = vld [vmem:[%s2190_s1] sm:$0x3]  ;;  %v1363_v57 = vld [vmem:[%s2190_s1 + $0x2] sm:$0x3]  ;;  %s1327_s22 = sshll.u32 %s1802_s21, 4  ;;  %s1328_s22 = int_to_ptr.vmem [resolvable:$true] %s1327_s22 }
   0xb   :  { %1506 = vmatmul.mubr.bf16.vlgmr.msra.gmra.mrb[0].mxu1 %v1801_v6  ;;  %1511 = vmatprep.subr.bf16.mxu0 %v1799_v1  ;;  %v237_v37 = vld [vmem:[%s2191_s2] sm:$0x3]  ;;  %p1780_p1 = scmp.lt.s32.totalorder %s1328_s22, %s1328_s22 }
   0xc   :  { %1518 = vmatpush3.bf16.msra.mxu1 %v1841_v0  ;;  %1521 = vmatprep.mubr.msk.bf16.mxu1 %vm1800_vm0, %v1799_v1 }
   0xd   :  { %1519 = vmatprep.subr.bf16.mxu1 %v1799_v1 }
   0xe   :  { %1512 = vmatpush3.bf16.msra.mxu0 %v1881_v7 }
   0xf   :  { %1525 = vmatprep.subr.bf16.mxu0 %v1799_v1 }
  0x10   :  { %1520 = vmatpush3.bf16.msra.mxu1 %v1847_v2 }
  0x11   :  { %1514 = vmatmul.mubr.bf16.vlgmr.msra.gmra.mrb[4].mxu0 %v1801_v6  ;;  %1533 = vmatprep.subr.bf16.mxu1 %v1799_v1 }
  0x12   :  { %1526 = vmatpush3.bf16.msra.mxu0 %v1856_v3  ;;  %1529 = vmatprep.mubr.msk.bf16.mxu0 %vm1800_vm0, %v1799_v1 }
  0x13   :  { %1527 = vmatprep.subr.bf16.mxu0 %v1799_v1 }
  0x16   :  { %1528 = vmatpush3.bf16.msra.mxu0 %v1865_v4 }
  0x17   :  { %1541 = vmatprep.subr.bf16.mxu0 %v1799_v1 }
  0xdc   :  { %v99_v9 = vpop.f32.mrb[0].mxu0 }
  0xdd   :  { %v100_v12 = vadd.f32 %v1903_v8, %v99_v9  ;;  %v1499_v13 = vpop.f32.mrb[1].mxu0 }
  0xde   :  { %v102_v14 = vpop.f32.mrb[2].mxu0  ;;  %v157_v15 = vpop.f32.mrb[0].mxu1 }
  0xdf   :  { %v222_v17 = vadd.f32 %v221_v10, %v100_v12  ;;  %v1500_v18 = vpop.f32.mrb[3].mxu0  ;;  %v158_v19 = vadd.f32 %v1911_v11, %v157_v15  ;;  %v1507_v20 = vpop.f32.mrb[1].mxu1 }
  0xe0   :  { %v160_v21 = vpop.f32.mrb[2].mxu1  ;;  %v1365_v18 = vld [vmem:[%s2191_s2 + $0x2] sm:$0x3] }
  0xe1   :  { %v1356_v22 = vmul.f32 -1.442695, %v222_v17  ;;  %v230_v23 = vadd.f32 %v229_v16, %v158_v19  ;;  %v1508_v24 = vpop.f32.mrb[3].mxu1 }
  0xe3   :  { %1695 = vpow2.f32 %v1356_v22  ;;  %v1357_v25 = vmul.f32 -1.442695, %v230_v23 }
  0xe4   :  { %v215_v26 = vpop.f32.mrb[4].mxu0 }
  0xe5   :  { %v1515_v27 = vpop.f32.mrb[5].mxu0  ;;  %1697 = vpow2.f32 %v1357_v25  ;;  %v216_v35 = vadd.f32 %v1921_v33, %v215_v26 }
  0xe6   :  { %v218_v28 = vpop.f32.mrb[6].mxu0 }
  0xe7   :  { %v1516_v29 = vpop.f32.mrb[7].mxu0 }
  0xe8   :  { %v1370_v29 = vld [vmem:[%s2189_s0 + $0x4] sm:$0x3] }
  0xed   :  { %v1696_v30 = vpop.eup %1695 }
  0xee   :  { %v226_v31 = vadd.f32 1.0, %v1696_v30 }
  0xef   :  { %v1698_v32 = vpop.eup %1697 }
  0xf0   :  { %1699 = vrcp.f32 %v226_v31  ;;  %v234_v34 = vadd.f32 1.0, %v1698_v32 }
  0xf2   :  { %1701 = vrcp.f32 %v234_v34 }
  0xfa   :  { %v1700_v36 = vpop.eup %1699 }
  0xfb   :  { %v238_v38 = vmul.f32 %v1700_v36, %v216_v35 }
  0xfc   :  { %v1702_v40 = vpop.eup %1701 }
  0xfd   :  { %v239_v39 = vadd.f32 %v238_v38, %v237_v37  ;;  %v241_v41 = vsub.f32 1.0, %v1702_v40  ;;  %v243_v43 = vmul.f32 0.0, %v1702_v40 }
  0xff   :  { %1703 = vtanh.f32 %v239_v39  ;;  %v1372_v39 = vld [vmem:[%s2190_s1 + $0x4] sm:$0x3] }
 0x109   :  { %v1704_v42 = vpop.eup %1703 }
 0x10a   :  { %v242_v44 = vmul.f32 %v1704_v42, %v241_v41 }
 0x10c   :  { %v244_v45 = vadd.f32 %v243_v43, %v242_v44 }
 0x10e   :  { %246 = vst.msk [vmem:[%s2194_s5] sm:$0x3] %vm245_vm1, %v244_v45  ;;  %v247_v46 = vpack.c.bf16 %v244_v45, %v244_v45 }
 0x110   :  { %1522 = vmatmul.mubr.msk.bf16.vlgmr.msra.gmra.mrb[4].mxu1 %vm61_vm2, %v247_v46  ;;  %1530 = vmatmul.mubr.msk.bf16.vlgmr.msra.gmra.mrb[8].mxu0 %vm61_vm2, %v247_v46 }
 0x111   :  { %1534 = vmatpush3.bf16.msra.mxu1 %v1872_v5  ;;  %1537 = vmatprep.mubr.msk.bf16.mxu1 %vm1800_vm0, %v1799_v1 }
 0x112   :  { %1535 = vmatprep.subr.bf16.mxu1 %v1799_v1  ;;  %1542 = vmatpush3.bf16.msra.mxu0 %v1841_v0 }
 0x113   :  { %1543 = vmatprep.subr.bf16.mxu0 %v1799_v1  ;;  %1545 = vmatprep.mubr.msk.bf16.mxu0 %vm1800_vm0, %v1799_v1 }
 0x115   :  { %1536 = vmatpush3.bf16.msra.mxu1 %v1881_v7 }
 0x116   :  { %1549 = vmatprep.subr.bf16.mxu1 %v1799_v1  ;;  %1544 = vmatpush3.bf16.msra.mxu0 %v1847_v2 }
 0x117   :  { %1557 = vmatprep.subr.bf16.mxu0 %v1799_v1 }
 0x118   :  { %1538 = vmatmul.mubr.msk.bf16.vlgmr.msra.gmra.mrb[8].mxu1 %vm61_vm2, %v247_v46 }
 0x119   :  { %1550 = vmatpush3.bf16.msra.mxu1 %v1856_v3  ;;  %1553 = vmatprep.mubr.msk.bf16.mxu1 %vm1800_vm0, %v1799_v1 }
 0x11a   :  { %1551 = vmatprep.subr.bf16.mxu1 %v1799_v1 }
 0x11d   :  { %1552 = vmatpush3.bf16.msra.mxu1 %v1865_v4 }
 0x11e   :  { %1565 = vmatprep.subr.bf16.mxu1 %v1799_v1 }
 0x1e3   :  { %v285_v47 = vpop.f32.mrb[4].mxu1  ;;  %v325_v49 = vpop.f32.mrb[8].mxu0 }
 0x1e4   :  { %v286_v50 = vadd.f32 %v1903_v8, %v285_v47  ;;  %v1523_v51 = vpop.f32.mrb[5].mxu1  ;;  %v1531_v52 = vpop.f32.mrb[9].mxu0  ;;  %v326_v53 = vadd.f32 %v1911_v11, %v325_v49 }
 0x1e5   :  { %v288_v54 = vpop.f32.mrb[6].mxu1  ;;  %v328_v55 = vpop.f32.mrb[10].mxu0 }
 0x1e6   :  { %v373_v56 = vadd.f32 %v1361_v48, %v286_v50  ;;  %v1524_v58 = vpop.f32.mrb[7].mxu1  ;;  %v1532_v59 = vpop.f32.mrb[11].mxu0  ;;  %v382_v61 = vadd.f32 %v1363_v57, %v326_v53  ;;  %v1374_v55 = vld [vmem:[%s2191_s2 + $0x4] sm:$0x3] }
 0x1e8   :  { %v1362_v60 = vmul.f32 -1.442695, %v373_v56  ;;  %v1364_v6 = vmul.f32 -1.442695, %v382_v61 }
 0x1ea   :  { %1705 = vpow2.f32 %v1362_v60 }
 0x1eb   :  { %v365_v62 = vpop.f32.mrb[8].mxu1  ;;  %1707 = vpow2.f32 %v1364_v6 }
 0x1ec   :  { %v1539_v63 = vpop.f32.mrb[9].mxu1  ;;  %v366_v16 = vadd.f32 %v1921_v33, %v365_v62 }
 0x1ed   :  { %v368_v9 = vpop.f32.mrb[10].mxu1 }
 0x1ee   :  { %v1540_v10 = vpop.f32.mrb[11].mxu1 }
 0x1ef   :  { %v1379_v10 = vld [vmem:[%s2189_s0 + $0x6] sm:$0x3] }
 0x1f4   :  { %v1706_v12 = vpop.eup %1705 }
 0x1f5   :  { %v377_v13 = vadd.f32 1.0, %v1706_v12  ;;  %v1708_v14 = vpop.eup %1707 }
 0x1f6   :  { %v386_v15 = vadd.f32 1.0, %v1708_v14 }
 0x1f7   :  { %1709 = vrcp.f32 %v377_v13 }
 0x1f8   :  { %1711 = vrcp.f32 %v386_v15 }
 0x201   :  { %v1710_v17 = vpop.eup %1709 }
 0x202   :  { %v391_v19 = vmul.f32 %v1710_v17, %v366_v16  ;;  %v1712_v21 = vpop.eup %1711 }
 0x203   :  { %v394_v22 = vsub.f32 1.0, %v1712_v21  ;;  %v396_v24 = vmul.f32 %v1712_v21, %v244_v45 }
 0x204   :  { %v392_v20 = vadd.f32 %v1365_v18, %v391_v19 }
 0x206   :  { %1713 = vtanh.f32 %v392_v20  ;;  %v1381_v20 = vld [vmem:[%s2190_s1 + $0x6] sm:$0x3] }
 0x210   :  { %v1714_v23 = vpop.eup %1713 }
 0x211   :  { %v395_v25 = vmul.f32 %v1714_v23, %v394_v22 }
 0x213   :  { %v397_v26 = vadd.f32 %v396_v24, %v395_v25 }
 0x215   :  { %1366 = vst.msk [vmem:[%s2194_s5 + $0x2] sm:$0x3] %vm245_vm1, %v397_v26  ;;  %v400_v27 = vpack.c.bf16 %v397_v26, %v397_v26 }
 0x217   :  { %1546 = vmatmul.mubr.msk.bf16.vlgmr.msra.gmra.mrb[12].mxu0 %vm61_vm2, %v400_v27  ;;  %1554 = vmatmul.mubr.msk.bf16.vlgmr.msra.gmra.mrb[12].mxu1 %vm61_vm2, %v400_v27 }
 0x218   :  { %1558 = vmatpush3.bf16.msra.mxu0 %v1872_v5  ;;  %1561 = vmatprep.mubr.msk.bf16.mxu0 %vm1800_vm0, %v1799_v1 }
 0x219   :  { %1559 = vmatprep.subr.bf16.mxu0 %v1799_v1  ;;  %1566 = vmatpush3.bf16.msra.mxu1 %v1841_v0 }
 0x21a   :  { %1567 = vmatprep.subr.bf16.mxu1 %v1799_v1  ;;  %1569 = vmatprep.mubr.msk.bf16.mxu1 %vm1800_vm0, %v1799_v1 }
 0x21c   :  { %1560 = vmatpush3.bf16.msra.mxu0 %v1881_v7 }
 0x21d   :  { %1573 = vmatprep.subr.bf16.mxu0 %v1799_v1  ;;  %1568 = vmatpush3.bf16.msra.mxu1 %v1847_v2 }
 0x21e   :  { %1581 = vmatprep.subr.bf16.mxu1 %v1799_v1 }
 0x21f   :  { %1562 = vmatmul.mubr.msk.bf16.vlgmr.msra.gmra.mrb[16].mxu0 %vm61_vm2, %v400_v27 }
 0x220   :  { %1574 = vmatpush3.bf16.msra.mxu0 %v1856_v3  ;;  %1577 = vmatprep.mubr.msk.bf16.mxu0 %vm1800_vm0, %v1799_v1 }
 0x221   :  { %1575 = vmatprep.subr.bf16.mxu0 %v1799_v1 }
 0x224   :  { %1576 = vmatpush3.bf16.msra.mxu0 %v1865_v4 }
 0x225   :  { %1589 = vmatprep.subr.bf16.mxu0 %v1799_v1 }
 0x2ea   :  { %v438_v28 = vpop.f32.mrb[12].mxu0  ;;  %v478_v30 = vpop.f32.mrb[12].mxu1 }
 0x2eb   :  { %v439_v31 = vadd.f32 %v1903_v8, %v438_v28  ;;  %v1547_v32 = vpop.f32.mrb[13].mxu0  ;;  %v1555_v34 = vpop.f32.mrb[13].mxu1  ;;  %v479_v35 = vadd.f32 %v1911_v11, %v478_v30 }
 0x2ec   :  { %v441_v36 = vpop.f32.mrb[14].mxu0  ;;  %v481_v37 = vpop.f32.mrb[14].mxu1 }
 0x2ed   :  { %v526_v38 = vadd.f32 %v1370_v29, %v439_v31  ;;  %v1548_v40 = vpop.f32.mrb[15].mxu0  ;;  %v1556_v41 = vpop.f32.mrb[15].mxu1  ;;  %v535_v43 = vadd.f32 %v1372_v39, %v479_v35  ;;  %v1383_v37 = vld [vmem:[%s2191_s2 + $0x6] sm:$0x3] }
 0x2ef   :  { %v1371_v42 = vmul.f32 -1.442695, %v526_v38  ;;  %v1373_v46 = vmul.f32 -1.442695, %v535_v43 }
 0x2f1   :  { %1715 = vpow2.f32 %v1371_v42 }
 0x2f2   :  { %v518_v44 = vpop.f32.mrb[16].mxu0  ;;  %1717 = vpow2.f32 %v1373_v46 }
 0x2f3   :  { %v1563_v45 = vpop.f32.mrb[17].mxu0  ;;  %v519_v53 = vadd.f32 %v1921_v33, %v518_v44 }
 0x2f4   :  { %v521_v47 = vpop.f32.mrb[18].mxu0 }
 0x2f5   :  { %v1564_v48 = vpop.f32.mrb[19].mxu0 }
 0x2f6   :  { %v1388_v48 = vld [vmem:[%s2189_s0 + $0x8] sm:$0x3] }
 0x2fb   :  { %v1716_v49 = vpop.eup %1715 }
 0x2fc   :  { %v530_v50 = vadd.f32 1.0, %v1716_v49  ;;  %v1718_v51 = vpop.eup %1717 }
 0x2fd   :  { %v539_v52 = vadd.f32 1.0, %v1718_v51 }
 0x2fe   :  { %1719 = vrcp.f32 %v530_v50 }
 0x2ff   :  { %1721 = vrcp.f32 %v539_v52 }
 0x308   :  { %v1720_v54 = vpop.eup %1719 }
 0x309   :  { %v544_v56 = vmul.f32 %v1720_v54, %v519_v53  ;;  %v1722_v58 = vpop.eup %1721 }
 0x30a   :  { %v547_v59 = vsub.f32 1.0, %v1722_v58  ;;  %v549_v61 = vmul.f32 %v1722_v58, %v397_v26 }
 0x30b   :  { %v545_v57 = vadd.f32 %v1374_v55, %v544_v56 }
 0x30d   :  { %1723 = vtanh.f32 %v545_v57  ;;  %v1390_v57 = vld [vmem:[%s2190_s1 + $0x8] sm:$0x3] }
 0x317   :  { %v1724_v60 = vpop.eup %1723 }
 0x318   :  { %v548_v62 = vmul.f32 %v1724_v60, %v547_v59 }
 0x31a   :  { %v550_v63 = vadd.f32 %v549_v61, %v548_v62 }
 0x31c   :  { %1375 = vst.msk [vmem:[%s2194_s5 + $0x4] sm:$0x3] %vm245_vm1, %v550_v63  ;;  %v553_v6 = vpack.c.bf16 %v550_v63, %v550_v63 }
 0x31e   :  { %1570 = vmatmul.mubr.msk.bf16.vlgmr.msra.gmra.mrb[16].mxu1 %vm61_vm2, %v553_v6  ;;  %1578 = vmatmul.mubr.msk.bf16.vlgmr.msra.gmra.mrb[20].mxu0 %vm61_vm2, %v553_v6 }
 0x31f   :  { %1582 = vmatpush3.bf16.msra.mxu1 %v1872_v5  ;;  %1585 = vmatprep.mubr.msk.bf16.mxu1 %vm1800_vm0, %v1799_v1 }
 0x320   :  { %1583 = vmatprep.subr.bf16.mxu1 %v1799_v1  ;;  %1590 = vmatpush3.bf16.msra.mxu0 %v1841_v0 }
 0x321   :  { %1591 = vmatprep.subr.bf16.mxu0 %v1799_v1  ;;  %1593 = vmatprep.mubr.msk.bf16.mxu0 %vm1800_vm0, %v1799_v1 }
 0x323   :  { %1584 = vmatpush3.bf16.msra.mxu1 %v1881_v7 }
 0x324   :  { %1597 = vmatprep.subr.bf16.mxu1 %v1799_v1  ;;  %1592 = vmatpush3.bf16.msra.mxu0 %v1847_v2 }
 0x325   :  { %1605 = vmatprep.subr.bf16.mxu0 %v1799_v1 }
 0x326   :  { %1586 = vmatmul.mubr.msk.bf16.vlgmr.msra.gmra.mrb[20].mxu1 %vm61_vm2, %v553_v6 }
 0x327   :  { %1598 = vmatpush3.bf16.msra.mxu1 %v1856_v3  ;;  %1601 = vmatprep.mubr.msk.bf16.mxu1 %vm1800_vm0, %v1799_v1 }
 0x328   :  { %1599 = vmatprep.subr.bf16.mxu1 %v1799_v1 }
 0x32b   :  { %1600 = vmatpush3.bf16.msra.mxu1 %v1865_v4 }
 0x32c   :  { %1613 = vmatprep.subr.bf16.mxu1 %v1799_v1 }
 0x3f1   :  { %v591_v9 = vpop.f32.mrb[16].mxu1  ;;  %v631_v12 = vpop.f32.mrb[20].mxu0 }
 0x3f2   :  { %v592_v13 = vadd.f32 %v1903_v8, %v591_v9  ;;  %v1571_v14 = vpop.f32.mrb[17].mxu1  ;;  %v1579_v15 = vpop.f32.mrb[21].mxu0  ;;  %v632_v16 = vadd.f32 %v1911_v11, %v631_v12 }
 0x3f3   :  { %v594_v17 = vpop.f32.mrb[18].mxu1  ;;  %v634_v18 = vpop.f32.mrb[22].mxu0 }
 0x3f4   :  { %v679_v19 = vadd.f32 %v1379_v10, %v592_v13  ;;  %v1572_v21 = vpop.f32.mrb[19].mxu1  ;;  %v1580_v22 = vpop.f32.mrb[23].mxu0  ;;  %v688_v24 = vadd.f32 %v1381_v20, %v632_v16  ;;  %v1392_v18 = vld [vmem:[%s2191_s2 + $0x8] sm:$0x3] }
 0x3f6   :  { %v1380_v23 = vmul.f32 -1.442695, %v679_v19  ;;  %v1382_v27 = vmul.f32 -1.442695, %v688_v24 }
 0x3f8   :  { %1725 = vpow2.f32 %v1380_v23 }
 0x3f9   :  { %v671_v25 = vpop.f32.mrb[20].mxu1  ;;  %1727 = vpow2.f32 %v1382_v27 }
 0x3fa   :  { %v1587_v26 = vpop.f32.mrb[21].mxu1  ;;  %v672_v35 = vadd.f32 %v1921_v33, %v671_v25 }
 0x3fb   :  { %v674_v28 = vpop.f32.mrb[22].mxu1 }
 0x3fc   :  { %v1588_v29 = vpop.f32.mrb[23].mxu1 }
 0x3fd   :  { %v1397_v29 = vld [vmem:[%s2189_s0 + $0xa] sm:$0x3] }
 0x402   :  { %v1726_v30 = vpop.eup %1725 }
 0x403   :  { %v683_v31 = vadd.f32 1.0, %v1726_v30  ;;  %v1728_v32 = vpop.eup %1727 }
 0x404   :  { %v692_v34 = vadd.f32 1.0, %v1728_v32 }
 0x405   :  { %1729 = vrcp.f32 %v683_v31 }
 0x406   :  { %1731 = vrcp.f32 %v692_v34 }
 0x40f   :  { %v1730_v36 = vpop.eup %1729 }
 0x410   :  { %v697_v38 = vmul.f32 %v1730_v36, %v672_v35  ;;  %v1732_v40 = vpop.eup %1731 }
 0x411   :  { %v700_v41 = vsub.f32 1.0, %v1732_v40  ;;  %v702_v43 = vmul.f32 %v1732_v40, %v550_v63 }
 0x412   :  { %v698_v39 = vadd.f32 %v1383_v37, %v697_v38 }
 0x414   :  { %1733 = vtanh.f32 %v698_v39  ;;  %v1399_v39 = vld [vmem:[%s2190_s1 + $0xa] sm:$0x3] }
 0x41e   :  { %v1734_v42 = vpop.eup %1733 }
 0x41f   :  { %v701_v44 = vmul.f32 %v1734_v42, %v700_v41 }
 0x421   :  { %v703_v45 = vadd.f32 %v702_v43, %v701_v44 }
 0x423   :  { %1384 = vst.msk [vmem:[%s2194_s5 + $0x6] sm:$0x3] %vm245_vm1, %v703_v45  ;;  %v706_v46 = vpack.c.bf16 %v703_v45, %v703_v45 }
 0x425   :  { %1594 = vmatmul.mubr.msk.bf16.vlgmr.msra.gmra.mrb[24].mxu0 %vm61_vm2, %v706_v46  ;;  %1602 = vmatmul.mubr.msk.bf16.vlgmr.msra.gmra.mrb[24].mxu1 %vm61_vm2, %v706_v46 }
 0x426   :  { %1606 = vmatpush3.bf16.msra.mxu0 %v1872_v5  ;;  %1609 = vmatprep.mubr.msk.bf16.mxu0 %vm1800_vm0, %v1799_v1 }
 0x427   :  { %1607 = vmatprep.subr.bf16.mxu0 %v1799_v1  ;;  %1614 = vmatpush3.bf16.msra.mxu1 %v1841_v0 }
 0x428   :  { %1615 = vmatprep.subr.bf16.mxu1 %v1799_v1  ;;  %1617 = vmatprep.mubr.msk.bf16.mxu1 %vm1800_vm0, %v1799_v1 }
 0x42a   :  { %1608 = vmatpush3.bf16.msra.mxu0 %v1881_v7 }
 0x42b   :  { %1621 = vmatprep.subr.bf16.mxu0 %v1799_v1  ;;  %1616 = vmatpush3.bf16.msra.mxu1 %v1847_v2 }
 0x42c   :  { %1629 = vmatprep.subr.bf16.mxu1 %v1799_v1 }
 0x42d   :  { %1610 = vmatmul.mubr.msk.bf16.vlgmr.msra.gmra.mrb[28].mxu0 %vm61_vm2, %v706_v46 }
 0x42e   :  { %1622 = vmatpush3.bf16.msra.mxu0 %v1856_v3  ;;  %1625 = vmatprep.mubr.msk.bf16.mxu0 %vm1800_vm0, %v1799_v1 }
 0x42f   :  { %1623 = vmatprep.subr.bf16.mxu0 %v1799_v1 }
 0x432   :  { %1624 = vmatpush3.bf16.msra.mxu0 %v1865_v4 }
 0x433   :  { %1637 = vmatprep.subr.bf16.mxu0 %v1799_v1 }
 0x4f8   :  { %v744_v47 = vpop.f32.mrb[24].mxu0  ;;  %v784_v49 = vpop.f32.mrb[24].mxu1 }
 0x4f9   :  { %v745_v50 = vadd.f32 %v1903_v8, %v744_v47  ;;  %v1595_v51 = vpop.f32.mrb[25].mxu0  ;;  %v1603_v52 = vpop.f32.mrb[25].mxu1  ;;  %v785_v53 = vadd.f32 %v1911_v11, %v784_v49 }
 0x4fa   :  { %v747_v54 = vpop.f32.mrb[26].mxu0  ;;  %v787_v55 = vpop.f32.mrb[26].mxu1 }
 0x4fb   :  { %v832_v56 = vadd.f32 %v1388_v48, %v745_v50  ;;  %v1596_v58 = vpop.f32.mrb[27].mxu0  ;;  %v1604_v59 = vpop.f32.mrb[27].mxu1  ;;  %v841_v61 = vadd.f32 %v1390_v57, %v785_v53  ;;  %v1401_v55 = vld [vmem:[%s2191_s2 + $0xa] sm:$0x3] }
 0x4fd   :  { %v1389_v60 = vmul.f32 -1.442695, %v832_v56  ;;  %v1391_v6 = vmul.f32 -1.442695, %v841_v61 }
 0x4ff   :  { %1735 = vpow2.f32 %v1389_v60 }
 0x500   :  { %v824_v62 = vpop.f32.mrb[28].mxu0  ;;  %1737 = vpow2.f32 %v1391_v6 }
 0x501   :  { %v1611_v63 = vpop.f32.mrb[29].mxu0  ;;  %v825_v16 = vadd.f32 %v1921_v33, %v824_v62 }
 0x502   :  { %v827_v9 = vpop.f32.mrb[30].mxu0 }
 0x503   :  { %v1612_v10 = vpop.f32.mrb[31].mxu0  ;;  %v1406_v9 = vld [vmem:[%s2189_s0 + $0xc] sm:$0x3] }
 0x509   :  { %v1736_v12 = vpop.eup %1735 }
 0x50a   :  { %v836_v13 = vadd.f32 1.0, %v1736_v12  ;;  %v1738_v14 = vpop.eup %1737 }
 0x50b   :  { %v845_v15 = vadd.f32 1.0, %v1738_v14 }
 0x50c   :  { %1739 = vrcp.f32 %v836_v13 }
 0x50d   :  { %1741 = vrcp.f32 %v845_v15 }
 0x516   :  { %v1740_v17 = vpop.eup %1739 }
 0x517   :  { %v850_v19 = vmul.f32 %v1740_v17, %v825_v16  ;;  %v1742_v21 = vpop.eup %1741  ;;  %v1408_v17 = vld [vmem:[%s2190_s1 + $0xc] sm:$0x3] }
 0x518   :  { %v853_v22 = vsub.f32 1.0, %v1742_v21  ;;  %v855_v24 = vmul.f32 %v1742_v21, %v703_v45 }
 0x519   :  { %v851_v20 = vadd.f32 %v1392_v18, %v850_v19 }
 0x51b   :  { %1743 = vtanh.f32 %v851_v20 }
 0x525   :  { %v1744_v23 = vpop.eup %1743 }
 0x526   :  { %v854_v25 = vmul.f32 %v1744_v23, %v853_v22 }
 0x528   :  { %v856_v26 = vadd.f32 %v855_v24, %v854_v25 }
 0x52a   :  { %1393 = vst.msk [vmem:[%s2194_s5 + $0x8] sm:$0x3] %vm245_vm1, %v856_v26  ;;  %v859_v27 = vpack.c.bf16 %v856_v26, %v856_v26 }
 0x52c   :  { %1618 = vmatmul.mubr.msk.bf16.vlgmr.msra.gmra.mrb[28].mxu1 %vm61_vm2, %v859_v27  ;;  %1626 = vmatmul.mubr.msk.bf16.vlgmr.msra.gmra.mrb[32].mxu0 %vm61_vm2, %v859_v27 }
 0x52d   :  { %1630 = vmatpush3.bf16.msra.mxu1 %v1872_v5  ;;  %1633 = vmatprep.mubr.msk.bf16.mxu1 %vm1800_vm0, %v1799_v1 }
 0x52e   :  { %1631 = vmatprep.subr.bf16.mxu1 %v1799_v1  ;;  %1638 = vmatpush3.bf16.msra.mxu0 %v1841_v0 }
 0x52f   :  { %1639 = vmatprep.subr.bf16.mxu0 %v1799_v1  ;;  %1641 = vmatprep.mubr.msk.bf16.mxu0 %vm1800_vm0, %v1799_v1 }
 0x531   :  { %1632 = vmatpush3.bf16.msra.mxu1 %v1881_v7 }
 0x532   :  { %1645 = vmatprep.subr.bf16.mxu1 %v1799_v1  ;;  %1640 = vmatpush3.bf16.msra.mxu0 %v1847_v2 }
 0x533   :  { %1653 = vmatprep.subr.bf16.mxu0 %v1799_v1 }
 0x534   :  { %1634 = vmatmul.mubr.msk.bf16.vlgmr.msra.gmra.mrb[32].mxu1 %vm61_vm2, %v859_v27 }
 0x535   :  { %1646 = vmatpush3.bf16.msra.mxu1 %v1856_v3  ;;  %1649 = vmatprep.mubr.msk.bf16.mxu1 %vm1800_vm0, %v1799_v1 }
 0x536   :  { %1647 = vmatprep.subr.bf16.mxu1 %v1799_v1 }
 0x539   :  { %1648 = vmatpush3.bf16.msra.mxu1 %v1865_v4 }
 0x53a   :  { %1661 = vmatprep.subr.bf16.mxu1 %v1799_v1 }
 0x5ff   :  { %v897_v28 = vpop.f32.mrb[28].mxu1  ;;  %v937_v30 = vpop.f32.mrb[32].mxu0 }
 0x600   :  { %v898_v31 = vadd.f32 %v1903_v8, %v897_v28  ;;  %v1619_v32 = vpop.f32.mrb[29].mxu1  ;;  %v1627_v34 = vpop.f32.mrb[33].mxu0  ;;  %v938_v35 = vadd.f32 %v1911_v11, %v937_v30 }
 0x601   :  { %v900_v36 = vpop.f32.mrb[30].mxu1  ;;  %v940_v37 = vpop.f32.mrb[34].mxu0  ;;  %v1410_v32 = vld [vmem:[%s2191_s2 + $0xc] sm:$0x3] }
 0x602   :  { %v985_v38 = vadd.f32 %v1397_v29, %v898_v31  ;;  %v1620_v40 = vpop.f32.mrb[31].mxu1  ;;  %v1628_v41 = vpop.f32.mrb[35].mxu0  ;;  %v994_v43 = vadd.f32 %v1399_v39, %v938_v35 }
 0x604   :  { %v1398_v42 = vmul.f32 -1.442695, %v985_v38  ;;  %v1400_v46 = vmul.f32 -1.442695, %v994_v43 }
 0x606   :  { %1745 = vpow2.f32 %v1398_v42 }
 0x607   :  { %v977_v44 = vpop.f32.mrb[32].mxu1  ;;  %1747 = vpow2.f32 %v1400_v46 }
 0x608   :  { %v1635_v45 = vpop.f32.mrb[33].mxu1  ;;  %v978_v53 = vadd.f32 %v1921_v33, %v977_v44  ;;  %v1415_v44 = vld [vmem:[%s2189_s0 + $0xe] sm:$0x3] }
 0x609   :  { %v980_v47 = vpop.f32.mrb[34].mxu1 }
 0x60a   :  { %v1636_v48 = vpop.f32.mrb[35].mxu1 }
 0x610   :  { %v1746_v49 = vpop.eup %1745 }
 0x611   :  { %v989_v50 = vadd.f32 1.0, %v1746_v49  ;;  %v1748_v51 = vpop.eup %1747 }
 0x612   :  { %v998_v52 = vadd.f32 1.0, %v1748_v51 }
 0x613   :  { %1749 = vrcp.f32 %v989_v50 }
 0x614   :  { %1751 = vrcp.f32 %v998_v52 }
 0x61d   :  { %v1750_v54 = vpop.eup %1749 }
 0x61e   :  { %v1003_v56 = vmul.f32 %v1750_v54, %v978_v53  ;;  %v1752_v58 = vpop.eup %1751 }
 0x61f   :  { %v1006_v59 = vsub.f32 1.0, %v1752_v58  ;;  %v1008_v61 = vmul.f32 %v1752_v58, %v856_v26 }
 0x620   :  { %v1004_v57 = vadd.f32 %v1401_v55, %v1003_v56 }
 0x622   :  { %1753 = vtanh.f32 %v1004_v57 }
 0x62c   :  { %v1754_v60 = vpop.eup %1753 }
 0x62d   :  { %v1007_v62 = vmul.f32 %v1754_v60, %v1006_v59 }
 0x62f   :  { %v1009_v63 = vadd.f32 %v1008_v61, %v1007_v62 }
 0x631   :  { %1402 = vst.msk [vmem:[%s2194_s5 + $0xa] sm:$0x3] %vm245_vm1, %v1009_v63  ;;  %v1012_v6 = vpack.c.bf16 %v1009_v63, %v1009_v63 }
 0x633   :  { %1642 = vmatmul.mubr.msk.bf16.vlgmr.msra.gmra.mrb[36].mxu0 %vm61_vm2, %v1012_v6  ;;  %1650 = vmatmul.mubr.msk.bf16.vlgmr.msra.gmra.mrb[36].mxu1 %vm61_vm2, %v1012_v6 }
 0x634   :  { %1654 = vmatpush3.bf16.msra.mxu0 %v1872_v5  ;;  %1657 = vmatprep.mubr.msk.bf16.mxu0 %vm1800_vm0, %v1799_v1 }
 0x635   :  { %1655 = vmatprep.subr.bf16.mxu0 %v1799_v1  ;;  %1662 = vmatpush3.bf16.msra.mxu1 %v1841_v0 }
 0x636   :  { %1663 = vmatprep.subr.bf16.mxu1 %v1799_v1  ;;  %1665 = vmatprep.mubr.msk.bf16.mxu1 %vm1800_vm0, %v1799_v1 }
 0x638   :  { %1656 = vmatpush3.bf16.msra.mxu0 %v1881_v7 }
 0x639   :  { %1669 = vmatprep.subr.bf16.mxu0 %v1799_v1  ;;  %1664 = vmatpush3.bf16.msra.mxu1 %v1847_v2 }
 0x63a   :  { %1677 = vmatprep.subr.bf16.mxu1 %v1799_v1 }
 0x63b   :  { %1658 = vmatmul.mubr.msk.bf16.vlgmr.msra.gmra.mrb[40].mxu0 %vm61_vm2, %v1012_v6  ;;  %v1419_v6 = vld [vmem:[%s2191_s2 + $0xe] sm:$0x3]  ;;  %s1775_s2 = scalar_lea.vmem %s1328_s22, 32 }
 0x63c   :  { %1670 = vmatpush3.bf16.msra.mxu0 %v1856_v3  ;;  %1673 = vmatprep.mubr.msk.bf16.mxu0 %vm1800_vm0, %v1799_v1  ;;  %p1776_p0 = scmp.ne.s32.totalorder %s1328_s22, %s1775_s2  ;;  %p1781_p2 = scmp.lt.s32.totalorder %s1775_s2, %s1775_s2 }
 0x63d   :  { %1671 = vmatprep.subr.bf16.mxu0 %v1799_v1 }
 0x63e   :  { %p1782_p3 = por %p1781_p2, %p1780_p1 }
 0x640   :  { %1672 = vmatpush3.bf16.msra.mxu0 %v1865_v4  ;;  %p1783_p4 = pnand %p1782_p3, %p1776_p0 }
 0x706   :  { %v1050_v0 = vpop.f32.mrb[36].mxu0  ;;  %v1090_v10 = vpop.f32.mrb[36].mxu1 }
 0x707   :  { %v1051_v2 = vadd.f32 %v1903_v8, %v1050_v0  ;;  %v1643_v12 = vpop.f32.mrb[37].mxu0  ;;  %v1651_v13 = vpop.f32.mrb[37].mxu1  ;;  %v1091_v14 = vadd.f32 %v1911_v11, %v1090_v10 }
 0x708   :  { %v1053_v3 = vpop.f32.mrb[38].mxu0  ;;  %v1093_v15 = vpop.f32.mrb[38].mxu1 }
 0x709   :  { %v1138_v16 = vadd.f32 %v1406_v9, %v1051_v2  ;;  %v1644_v4 = vpop.f32.mrb[39].mxu0  ;;  %v1652_v18 = vpop.f32.mrb[39].mxu1  ;;  %v1147_v20 = vadd.f32 %v1408_v17, %v1091_v14 }
 0x70b   :  { %v1407_v19 = vmul.f32 -1.442695, %v1138_v16  ;;  %v1409_v23 = vmul.f32 -1.442695, %v1147_v20 }
 0x70d   :  { %1755 = vpow2.f32 %v1407_v19 }
 0x70e   :  { %v1130_v21 = vpop.f32.mrb[40].mxu0  ;;  %1757 = vpow2.f32 %v1409_v23 }
 0x70f   :  { %v1659_v22 = vpop.f32.mrb[41].mxu0  ;;  %v1131_v30 = vadd.f32 %v1921_v33, %v1130_v21 }
 0x710   :  { %v1133_v24 = vpop.f32.mrb[42].mxu0 }
 0x711   :  { %v1660_v25 = vpop.f32.mrb[43].mxu0 }
 0x717   :  { %v1756_v26 = vpop.eup %1755 }
 0x718   :  { %v1142_v27 = vadd.f32 1.0, %v1756_v26  ;;  %v1758_v28 = vpop.eup %1757 }
 0x719   :  { %v1151_v29 = vadd.f32 1.0, %v1758_v28 }
 0x71a   :  { %1759 = vrcp.f32 %v1142_v27 }
 0x71b   :  { %1761 = vrcp.f32 %v1151_v29 }
 0x724   :  { %v1760_v31 = vpop.eup %1759 }
 0x725   :  { %v1156_v34 = vmul.f32 %v1760_v31, %v1131_v30  ;;  %v1762_v36 = vpop.eup %1761 }
 0x726   :  { %v1159_v37 = vsub.f32 1.0, %v1762_v36  ;;  %v1161_v39 = vmul.f32 %v1762_v36, %v1009_v63 }
 0x727   :  { %v1157_v35 = vadd.f32 %v1410_v32, %v1156_v34 }
 0x729   :  { %1763 = vtanh.f32 %v1157_v35 }
 0x733   :  { %v1764_v38 = vpop.eup %1763 }
 0x734   :  { %v1160_v40 = vmul.f32 %v1764_v38, %v1159_v37 }
 0x736   :  { %v1162_v41 = vadd.f32 %v1161_v39, %v1160_v40 }
 0x738   :  { %1411 = vst.msk [vmem:[%s2194_s5 + $0xc] sm:$0x3] %vm245_vm1, %v1162_v41  ;;  %v1165_v42 = vpack.c.bf16 %v1162_v41, %v1162_v41 }
 0x73a   :  { %1666 = vmatmul.mubr.msk.bf16.vlgmr.msra.gmra.mrb[40].mxu1 %vm61_vm2, %v1165_v42  ;;  %1674 = vmatmul.mubr.msk.bf16.vlgmr.msra.gmra.mrb[44].mxu0 %vm61_vm2, %v1165_v42 }
 0x73b   :  { %1678 = vmatpush3.bf16.msra.mxu1 %v1872_v5  ;;  %1681 = vmatprep.mubr.msk.bf16.mxu1 %vm1800_vm0, %v1799_v1 }
 0x73c   :  { %1679 = vmatprep.subr.bf16.mxu1 %v1799_v1  ;;  %v1417_v1 = vld [vmem:[%s2190_s1 + $0xe] sm:$0x3] }
 0x73f   :  { %1680 = vmatpush3.bf16.msra.mxu1 %v1881_v7 }
 0x742   :  { %1682 = vmatmul.mubr.msk.bf16.vlgmr.msra.gmra.mrb[44].mxu1 %vm61_vm2, %v1165_v42 }
 0x80d   :  { %v1203_v43 = vpop.f32.mrb[40].mxu1  ;;  %v1243_v45 = vpop.f32.mrb[44].mxu0 }
 0x80e   :  { %v1204_v46 = vadd.f32 %v1903_v8, %v1203_v43  ;;  %v1667_v47 = vpop.f32.mrb[41].mxu1  ;;  %v1675_v48 = vpop.f32.mrb[45].mxu0  ;;  %v1244_v5 = vadd.f32 %v1911_v11, %v1243_v45 }
 0x80f   :  { %v1206_v49 = vpop.f32.mrb[42].mxu1  ;;  %v1246_v50 = vpop.f32.mrb[46].mxu0 }
 0x810   :  { %v1291_v51 = vadd.f32 %v1415_v44, %v1204_v46  ;;  %v1668_v7 = vpop.f32.mrb[43].mxu1  ;;  %v1676_v52 = vpop.f32.mrb[47].mxu0  ;;  %v1300_v54 = vadd.f32 %v1417_v1, %v1244_v5 }
 0x812   :  { %v1416_v53 = vmul.f32 -1.442695, %v1291_v51  ;;  %v1418_v57 = vmul.f32 -1.442695, %v1300_v54 }
 0x814   :  { %1765 = vpow2.f32 %v1416_v53 }
 0x815   :  { %v1283_v55 = vpop.f32.mrb[44].mxu1  ;;  %1767 = vpow2.f32 %v1418_v57 }
 0x816   :  { %v1683_v56 = vpop.f32.mrb[45].mxu1  ;;  %v1284_v62 = vadd.f32 %v1921_v33, %v1283_v55 }
 0x817   :  { %v1286_v8 = vpop.f32.mrb[46].mxu1 }
 0x818   :  { %v1684_v58 = vpop.f32.mrb[47].mxu1 }
 0x81e   :  { %v1766_v59 = vpop.eup %1765 }
 0x81f   :  { %v1295_v11 = vadd.f32 1.0, %v1766_v59  ;;  %v1768_v60 = vpop.eup %1767 }
 0x820   :  { %v1304_v61 = vadd.f32 1.0, %v1768_v60 }
 0x821   :  { %1769 = vrcp.f32 %v1295_v11 }
 0x822   :  { %1771 = vrcp.f32 %v1304_v61 }
 0x82b   :  { %v1770_v63 = vpop.eup %1769 }
 0x82c   :  { %v1309_v0 = vmul.f32 %v1770_v63, %v1284_v62  ;;  %v1772_v10 = vpop.eup %1771 }
 0x82d   :  { %v1312_v2 = vsub.f32 1.0, %v1772_v10  ;;  %v1314_v14 = vmul.f32 %v1772_v10, %v1162_v41 }
 0x82e   :  { %v1310_v9 = vadd.f32 %v1419_v6, %v1309_v0 }
 0x830   :  { %1773 = vtanh.f32 %v1310_v9 }
 0x83a   :  { %v1774_v12 = vpop.eup %1773 }
 0x83b   :  { %v1313_v13 = vmul.f32 %v1774_v12, %v1312_v2 }
 0x83d   :  { %v1315_v3 = vadd.f32 %v1314_v14, %v1313_v13 }
 0x83f   :  { %1420 = vst.msk [vmem:[%s2194_s5 + $0xe] sm:$0x3] %vm245_vm1, %v1315_v3  ;;  %1318 = vst.msk [vmem:[#allocation2] sm:$0x3] %vm245_vm1, %v1315_v3 }
 0x840   :  { %1786 = shalt.err (!%p1783_p4)
}
 0x841   :  { %s1787_s27 = scalar_lea.hbm %s2195_s6, 32 }
 0x842   :  { %p1788_p5 = scmp.ne.s32.totalorder %s2195_s6, %s1787_s27  ;;  %p1791_p6 = scmp.lt.u32.totalorder %s1787_s27, %s2195_s6 }
 0x844   :  { %p1793_p7 = pnand %p1791_p6, %p1788_p5 }
 0x846   :  { %1796 = shalt.err (!%p1793_p7)
}
 0x847   :  { %1330 = dma.vmem_to_hbm [thread:$0]  %s1328_s22, 32, %s2195_s6, [#allocation3]  }
 0x848   :  { %1797 = dma.done.wait [#allocation3], 32  }
 0x849   :  { %1798 = vsyncadd [#allocation3], 4294967264 }
 0x84a   :  { %1336 = vsyncpa [#allocation3], 1 }

</bundles_post_ra>
